<compile_context>
chip_gen: v6e
topology: v6e:2x2x1
jax: 0.10.0
libtpu: 0.0.40
codegen_flags: <defaults>
</compile_context>

<pallas_src>
import functools

import jax
import jax.numpy as jnp
from jax import lax
from jax.experimental import pallas as pl
from jax.experimental.pallas import tpu as pltpu

EPS = 1e-8  # Project3D eps


def _pick_row_tile(H, W):
    # Size the per-step gather intermediates (three ~(TY, W, max(H, W)) f32 arrays)
    # to ~8 MiB so the whole step stays well inside VMEM (64 MiB ceiling on v7x).
    budget_elems = (8 * 1024 * 1024) // (4 * 3)
    per_row = W * max(H, W)
    cap = max(1, budget_elems // max(per_row, 1))
    if H <= cap:
        return H
    ty = (min(cap, H) // 8) * 8
    while ty >= 8:
        if H % ty == 0:
            return ty
        ty -= 8
    return H  # fallback: full image rows (full-extent block is always legal)


def _mv_depth_kernel(mats_sm, pred_ref, cur_ref, src_ref, out_ref, *, H, W, B, TY):
    k = pl.program_id(0)   # source frame (parallel)
    b = pl.program_id(1)   # batch        (reduction)
    t = pl.program_id(2)   # row tile     (reduction)

    @pl.when((b == 0) & (t == 0))
    def _():
        out_ref[...] = jnp.zeros_like(out_ref)

    # folded camera chain, 12 scalars per (k, b)
    base = (k * B + b) * 12
    m00 = mats_sm[base + 0]; m01 = mats_sm[base + 1]; m02 = mats_sm[base + 2]
    m10 = mats_sm[base + 3]; m11 = mats_sm[base + 4]; m12 = mats_sm[base + 5]
    m20 = mats_sm[base + 6]; m21 = mats_sm[base + 7]; m22 = mats_sm[base + 8]
    t0 = mats_sm[base + 9]; t1 = mats_sm[base + 10]; t2 = mats_sm[base + 11]

    # target pixel centres for this row tile (BackprojectDepth convention: x+0.5, y+0.5)
    x_i = lax.broadcasted_iota(jnp.int32, (TY, W), 1)
    y_i = lax.broadcasted_iota(jnp.int32, (TY, W), 0) + t * TY
    xs = x_i.astype(jnp.float32) + 0.5
    ys = y_i.astype(jnp.float32) + 0.5

    # ray coefficients: src_cam(d) = d * a + t  with  a = M3 @ [x+.5, y+.5, 1]
    ax = m00 * xs + m01 * ys + m02
    ay = m10 * xs + m11 * ys + m12
    az = m20 * xs + m21 * ys + m22

    # ---- project the current (GT) depth into the source view ----
    d_cur = cur_ref[0]                                   # (TY, W)
    proj_src_depth = d_cur * az + t2
    inv = 1.0 / (proj_src_depth + EPS)                   # shared perspective divide
    px = (d_cur * ax + t0) * inv
    py = (d_cur * ay + t1) * inv

    # F.grid_sample(nearest, padding='zeros', align_corners=False):
    # the normalize/denormalize round trip collapses to round(p - 0.5)
    ix = jnp.round(px - 0.5).astype(jnp.int32)           # round-half-even == nearbyint
    iy = jnp.round(py - 0.5).astype(jnp.int32)
    in_b = (ix >= 0) & (ix < W) & (iy >= 0) & (iy < H)
    ixc = jnp.clip(ix, 0, W - 1)
    iyc = jnp.clip(iy, 0, H - 1)

    # ---- nearest-neighbour gather from the VMEM-resident source depth map ----
    # Stage 1 (MXU): per-pixel source-ROW gather via a row one-hot batched matmul:
    #   rows_g[y, x, :] = src[iyc[y, x], :]
    # Stage 2 (VPU + lane reduce): pick column ixc with a one-hot select.
    src_img = src_ref[0, 0]                                        # (H, W)
    row_oh = (lax.broadcasted_iota(jnp.int32, (TY, W, H), 2)
              == iyc[:, :, None]).astype(jnp.float32)              # (TY, W, H)
    src_b = jnp.broadcast_to(src_img, (TY, H, W))                  # (TY, H, W)
    rows_g = jnp.einsum('ywh,yhx->ywx', row_oh, src_b,
                        preferred_element_type=jnp.float32)        # (TY, W, W)
    col_oh = (lax.broadcasted_iota(jnp.int32, (TY, W, W), 2)
              == ixc[:, :, None])                                  # (TY, W, W) bool
    sampled = jnp.sum(jnp.where(col_oh, rows_g, 0.0), axis=2)      # (TY, W)
    sampled = jnp.where(in_b, sampled, 0.0)                        # zeros padding

    valid = ((proj_src_depth < 1.05 * sampled)
             & (proj_src_depth > 0.0) & (sampled > 0.0))

    # ---- projected depth of the prediction + masked |log| error ----
    pred_src_depth = pred_ref[0] * az + t2
    diff = jnp.abs(jnp.log(sampled / pred_src_depth))   # == |log(s) - log(p)| incl. NaN cases
    include = valid & jnp.logical_not(jnp.isnan(diff))  # masked_select(...).nanmean()

    s = jnp.sum(jnp.where(include, diff, 0.0))
    c = jnp.sum(include.astype(jnp.float32))

    # single merged accumulator tile: sublanes 0-7 hold the sum, 8-15 the count
    row = lax.broadcasted_iota(jnp.int32, (1, 16, 128), 1)
    out_ref[...] = out_ref[...] + jnp.where(row < 8, s, c)


def mv_depth_loss(depth_pred_b1hw, cur_depth_b1hw, src_depth_bk1hw,
                  cur_invK_b44, src_K_bk44, cur_world_T_cam_b44,
                  src_cam_T_world_bk44):
    B, _, H, W = depth_pred_b1hw.shape
    Ksrc = src_depth_bk1hw.shape[1]
    f32 = jnp.float32

    pred = depth_pred_b1hw.reshape(B, H, W).astype(f32)
    cur = cur_depth_b1hw.reshape(B, H, W).astype(f32)
    src = jnp.transpose(src_depth_bk1hw.reshape(B, Ksrc, H, W), (1, 0, 2, 3)).astype(f32)

    # Fold the full camera chain offline (exact, just associativity):
    #   P  = src_K @ src_cam_T_world                       (b,k,4,4)
    #   A  = P[:, :3, :] @ cur_world_T_cam                 (b,k,3,4)
    #   M3 = A[:, :, :3] @ cur_invK[:3, :3]                (b,k,3,3)
    #   src_cam(d) = d * (M3 @ [x+.5, y+.5, 1]) + A[:, :, 3]
    P = jnp.einsum('bkij,bkjl->bkil', src_K_bk44.astype(f32),
                   src_cam_T_world_bk44.astype(f32))
    A = jnp.einsum('bkij,bjl->bkil', P[:, :, :3, :], cur_world_T_cam_b44.astype(f32))
    M3 = jnp.einsum('bkij,bjl->bkil', A[..., :3], cur_invK_b44[:, :3, :3].astype(f32))
    mats = jnp.concatenate([M3.reshape(B, Ksrc, 9), A[..., 3]], axis=-1)   # (b,k,12)
    mats_flat = jnp.transpose(mats, (1, 0, 2)).reshape(-1)                 # k-major, then b

    TY = _pick_row_tile(H, W)
    grid = (Ksrc, B, H // TY)

    kernel = functools.partial(_mv_depth_kernel, H=H, W=W, B=B, TY=TY)

    acc = pl.pallas_call(
        kernel,
        out_shape=jax.ShapeDtypeStruct((Ksrc, 16, 128), f32),
        grid=grid,
        in_specs=[
            pl.BlockSpec(memory_space=pltpu.MemorySpace.SMEM),          # folded matrices
            pl.BlockSpec((1, TY, W), lambda k, b, t: (b, t, 0)),        # depth_pred rows
            pl.BlockSpec((1, TY, W), lambda k, b, t: (b, t, 0)),        # cur_depth rows
            pl.BlockSpec((1, 1, H, W), lambda k, b, t: (k, b, 0, 0)),   # full src image (gather source)
        ],
        out_specs=pl.BlockSpec((1, 16, 128), lambda k, b, t: (k, 0, 0)),
        compiler_params=pltpu.CompilerParams(
            dimension_semantics=("parallel", "arbitrary", "arbitrary"),
            vmem_limit_bytes=48 * 1024 * 1024),
    )(mats_flat, pred, cur, src)

    sums = acc[:, 0, 0]
    cnts = acc[:, 8, 0]
    per_pair = sums / cnts          # nanmean of an empty selection -> NaN, like torch
    return jnp.sum(per_pair) / Ksrc


if __name__ == "__main__":
    B, Ksrc, H, W = 2, 2, 16, 16

    key = jax.random.PRNGKey(0)
    k1, k2, k3, k4 = jax.random.split(key, 4)

    # deterministic "parameters": pinhole intrinsics at depth resolution
    Kmat = jnp.array([[float(W), 0.0, W / 2.0, 0.0],
                      [0.0, float(H), H / 2.0, 0.0],
                      [0.0, 0.0, 1.0, 0.0],
                      [0.0, 0.0, 0.0, 1.0]], jnp.float32)
    invK = jnp.linalg.inv(Kmat)

    cur_invK_b44 = jnp.broadcast_to(invK, (B, 4, 4))
    src_K_bk44 = jnp.broadcast_to(Kmat, (B, Ksrc, 4, 4))

    cur_world_T_cam_b44 = jnp.broadcast_to(jnp.eye(4, dtype=jnp.float32), (B, 4, 4))
    trans = 0.05 * jax.random.normal(k1, (B, Ksrc, 3), jnp.float32)
    src_cam_T_world_bk44 = jnp.broadcast_to(jnp.eye(4, dtype=jnp.float32), (B, Ksrc, 4, 4))
    src_cam_T_world_bk44 = src_cam_T_world_bk44.at[:, :, :3, 3].set(trans)

    depth_pred_b1hw = 1.0 + 2.0 * jax.random.uniform(k2, (B, 1, H, W), jnp.float32)
    cur_depth_b1hw = 1.0 + 2.0 * jax.random.uniform(k3, (B, 1, H, W), jnp.float32)
    src_depth_bk1hw = 1.0 + 2.0 * jax.random.uniform(k4, (B, Ksrc, 1, H, W), jnp.float32)

    loss = jax.jit(mv_depth_loss)(depth_pred_b1hw, cur_depth_b1hw, src_depth_bk1hw,
                                  cur_invK_b44, src_K_bk44, cur_world_T_cam_b44,
                                  src_cam_T_world_bk44)
    loss = jax.block_until_ready(loss)
    assert loss.shape == () and bool(jnp.isfinite(loss))
    print("KERNEL_OK")
</pallas_src>

<mosaic_0001>
module attributes {stable_mosaic.version = 11 : i64} {
  func.func @_mv_depth_kernel(%arg0: i32, %arg1: i32, %arg2: i32, %arg3: memref<48xf32, #tpu.memory_space<smem>>, %arg4: memref<1x16x16xf32, #tpu.memory_space<vmem>>, %arg5: memref<1x16x16xf32, #tpu.memory_space<vmem>>, %arg6: memref<1x1x16x16xf32, #tpu.memory_space<vmem>>, %arg7: memref<1x16x128xf32, #tpu.memory_space<vmem>>) attributes {dimension_semantics = [#tpu.dimension_semantics<parallel>, #tpu.dimension_semantics<arbitrary>, #tpu.dimension_semantics<arbitrary>], iteration_bounds = array<i64: 2, 2, 1>, scalar_prefetch = 0 : i64, scratch_operands = 0 : i64, tpu.core_type = #tpu.core_type<tc>, window_params = [{transform_indices = @transform_0, window_bounds = array<i64: 48>}, {transform_indices = @transform_1, window_bounds = array<i64: 1, 16, 16>}, {transform_indices = @transform_2, window_bounds = array<i64: 1, 16, 16>}, {transform_indices = @transform_3, window_bounds = array<i64: 1, 1, 16, 16>}, {transform_indices = @transform_4, window_bounds = array<i64: 1, 16, 128>}]} {
    %c0_i32 = arith.constant 0 : i32
    %0 = arith.cmpi eq, %arg1, %c0_i32 : i32
    %c0_i32_0 = arith.constant 0 : i32
    %1 = arith.cmpi eq, %arg2, %c0_i32_0 : i32
    %2 = arith.andi %0, %1 : i1
    %3 = arith.extui %2 : i1 to i32
    %c0_i32_1 = arith.constant 0 : i32
    %4 = arith.cmpi ne, %3, %c0_i32_1 : i32
    scf.if %4 {
      %cst_43 = arith.constant 0.000000e+00 : f32
      %181 = vector.broadcast %cst_43 : f32 to vector<1x16x128xf32>
      %c0_44 = arith.constant 0 : index
      %c0_45 = arith.constant 0 : index
      %c0_46 = arith.constant 0 : index
      %182 = vector.load %arg7[%c0_44, %c0_45, %c0_46] : memref<1x16x128xf32, #tpu.memory_space<vmem>>, vector<1x16x128xf32>
      tpu.vector_store %arg7[%c0_44, %c0_45, %c0_46], %181 {strides = array<i32>} : memref<1x16x128xf32, #tpu.memory_space<vmem>>, vector<1x16x128xf32>,
    } else {
    }
    %c2_i32 = arith.constant 2 : i32
    %5 = arith.muli %arg0, %c2_i32 : i32
    %6 = arith.addi %5, %arg1 : i32
    %c12_i32 = arith.constant 12 : i32
    %7 = arith.muli %6, %c12_i32 : i32
    %c0_i32_2 = arith.constant 0 : i32
    %8 = arith.addi %7, %c0_i32_2 : i32
    %9 = arith.index_cast %8 : i32 to index
    %10 = memref.load %arg3[%9] : memref<48xf32, #tpu.memory_space<smem>>
    %c1_i32 = arith.constant 1 : i32
    %11 = arith.addi %7, %c1_i32 : i32
    %12 = arith.index_cast %11 : i32 to index
    %13 = memref.load %arg3[%12] : memref<48xf32, #tpu.memory_space<smem>>
    %c2_i32_3 = arith.constant 2 : i32
    %14 = arith.addi %7, %c2_i32_3 : i32
    %15 = arith.index_cast %14 : i32 to index
    %16 = memref.load %arg3[%15] : memref<48xf32, #tpu.memory_space<smem>>
    %c3_i32 = arith.constant 3 : i32
    %17 = arith.addi %7, %c3_i32 : i32
    %18 = arith.index_cast %17 : i32 to index
    %19 = memref.load %arg3[%18] : memref<48xf32, #tpu.memory_space<smem>>
    %c4_i32 = arith.constant 4 : i32
    %20 = arith.addi %7, %c4_i32 : i32
    %21 = arith.index_cast %20 : i32 to index
    %22 = memref.load %arg3[%21] : memref<48xf32, #tpu.memory_space<smem>>
    %c5_i32 = arith.constant 5 : i32
    %23 = arith.addi %7, %c5_i32 : i32
    %24 = arith.index_cast %23 : i32 to index
    %25 = memref.load %arg3[%24] : memref<48xf32, #tpu.memory_space<smem>>
    %c6_i32 = arith.constant 6 : i32
    %26 = arith.addi %7, %c6_i32 : i32
    %27 = arith.index_cast %26 : i32 to index
    %28 = memref.load %arg3[%27] : memref<48xf32, #tpu.memory_space<smem>>
    %c7_i32 = arith.constant 7 : i32
    %29 = arith.addi %7, %c7_i32 : i32
    %30 = arith.index_cast %29 : i32 to index
    %31 = memref.load %arg3[%30] : memref<48xf32, #tpu.memory_space<smem>>
    %c8_i32 = arith.constant 8 : i32
    %32 = arith.addi %7, %c8_i32 : i32
    %33 = arith.index_cast %32 : i32 to index
    %34 = memref.load %arg3[%33] : memref<48xf32, #tpu.memory_space<smem>>
    %c9_i32 = arith.constant 9 : i32
    %35 = arith.addi %7, %c9_i32 : i32
    %36 = arith.index_cast %35 : i32 to index
    %37 = memref.load %arg3[%36] : memref<48xf32, #tpu.memory_space<smem>>
    %c10_i32 = arith.constant 10 : i32
    %38 = arith.addi %7, %c10_i32 : i32
    %39 = arith.index_cast %38 : i32 to index
    %40 = memref.load %arg3[%39] : memref<48xf32, #tpu.memory_space<smem>>
    %c11_i32 = arith.constant 11 : i32
    %41 = arith.addi %7, %c11_i32 : i32
    %42 = arith.index_cast %41 : i32 to index
    %43 = memref.load %arg3[%42] : memref<48xf32, #tpu.memory_space<smem>>
    %44 = tpu.iota {dimensions = array<i32: 1>} : vector<16x16xi32>
    %45 = tpu.iota {dimensions = array<i32: 0>} : vector<16x16xi32>
    %c16_i32 = arith.constant 16 : i32
    %46 = arith.muli %arg2, %c16_i32 : i32
    %47 = vector.broadcast %46 : i32 to vector<16x16xi32>
    %48 = arith.addi %45, %47 : vector<16x16xi32>
    %49 = arith.sitofp %44 : vector<16x16xi32> to vector<16x16xf32>
    %cst = arith.constant 5.000000e-01 : f32
    %50 = vector.broadcast %cst : f32 to vector<16x16xf32>
    %51 = arith.addf %49, %50 : vector<16x16xf32>
    %52 = arith.sitofp %48 : vector<16x16xi32> to vector<16x16xf32>
    %cst_4 = arith.constant 5.000000e-01 : f32
    %53 = vector.broadcast %cst_4 : f32 to vector<16x16xf32>
    %54 = arith.addf %52, %53 : vector<16x16xf32>
    %55 = vector.broadcast %10 : f32 to vector<16x16xf32>
    %56 = arith.mulf %55, %51 : vector<16x16xf32>
    %57 = vector.broadcast %13 : f32 to vector<16x16xf32>
    %58 = arith.mulf %57, %54 : vector<16x16xf32>
    %59 = arith.addf %56, %58 : vector<16x16xf32>
    %60 = vector.broadcast %16 : f32 to vector<16x16xf32>
    %61 = arith.addf %59, %60 : vector<16x16xf32>
    %62 = vector.broadcast %19 : f32 to vector<16x16xf32>
    %63 = arith.mulf %62, %51 : vector<16x16xf32>
    %64 = vector.broadcast %22 : f32 to vector<16x16xf32>
    %65 = arith.mulf %64, %54 : vector<16x16xf32>
    %66 = arith.addf %63, %65 : vector<16x16xf32>
    %67 = vector.broadcast %25 : f32 to vector<16x16xf32>
    %68 = arith.addf %66, %67 : vector<16x16xf32>
    %69 = vector.broadcast %28 : f32 to vector<16x16xf32>
    %70 = arith.mulf %69, %51 : vector<16x16xf32>
    %71 = vector.broadcast %31 : f32 to vector<16x16xf32>
    %72 = arith.mulf %71, %54 : vector<16x16xf32>
    %73 = arith.addf %70, %72 : vector<16x16xf32>
    %74 = vector.broadcast %34 : f32 to vector<16x16xf32>
    %75 = arith.addf %73, %74 : vector<16x16xf32>
    %c0 = arith.constant 0 : index
    %c0_5 = arith.constant 0 : index
    %c0_6 = arith.constant 0 : index
    %76 = vector.load %arg5[%c0, %c0_5, %c0_6] : memref<1x16x16xf32, #tpu.memory_space<vmem>>, vector<1x16x16xf32>
    %77 = vector.shape_cast %76 : vector<1x16x16xf32> to vector<16x16xf32>
    %78 = arith.mulf %77, %75 : vector<16x16xf32>
    %79 = vector.broadcast %43 : f32 to vector<16x16xf32>
    %80 = arith.addf %78, %79 : vector<16x16xf32>
    %cst_7 = arith.constant 9.99999993E-9 : f32
    %81 = vector.broadcast %cst_7 : f32 to vector<16x16xf32>
    %82 = arith.addf %80, %81 : vector<16x16xf32>
    %cst_8 = arith.constant 1.000000e+00 : f32
    %83 = vector.broadcast %cst_8 : f32 to vector<16x16xf32>
    %84 = arith.divf %83, %82 : vector<16x16xf32>
    %85 = arith.mulf %77, %61 : vector<16x16xf32>
    %86 = vector.broadcast %37 : f32 to vector<16x16xf32>
    %87 = arith.addf %85, %86 : vector<16x16xf32>
    %88 = arith.mulf %87, %84 : vector<16x16xf32>
    %89 = arith.mulf %77, %68 : vector<16x16xf32>
    %90 = vector.broadcast %40 : f32 to vector<16x16xf32>
    %91 = arith.addf %89, %90 : vector<16x16xf32>
    %92 = arith.mulf %91, %84 : vector<16x16xf32>
    %cst_9 = arith.constant 5.000000e-01 : f32
    %93 = vector.broadcast %cst_9 : f32 to vector<16x16xf32>
    %94 = arith.subf %88, %93 : vector<16x16xf32>
    %95 = math.roundeven %94 : vector<16x16xf32>
    %96 = arith.fptosi %95 : vector<16x16xf32> to vector<16x16xi32>
    %cst_10 = arith.constant 5.000000e-01 : f32
    %97 = vector.broadcast %cst_10 : f32 to vector<16x16xf32>
    %98 = arith.subf %92, %97 : vector<16x16xf32>
    %99 = math.roundeven %98 : vector<16x16xf32>
    %100 = arith.fptosi %99 : vector<16x16xf32> to vector<16x16xi32>
    %c0_i32_11 = arith.constant 0 : i32
    %101 = vector.broadcast %c0_i32_11 : i32 to vector<16x16xi32>
    %102 = arith.cmpi sge, %96, %101 : vector<16x16xi32>
    %c16_i32_12 = arith.constant 16 : i32
    %103 = vector.broadcast %c16_i32_12 : i32 to vector<16x16xi32>
    %104 = arith.cmpi slt, %96, %103 : vector<16x16xi32>
    %105 = arith.andi %102, %104 : vector<16x16xi1>
    %c0_i32_13 = arith.constant 0 : i32
    %106 = vector.broadcast %c0_i32_13 : i32 to vector<16x16xi32>
    %107 = arith.cmpi sge, %100, %106 : vector<16x16xi32>
    %108 = arith.andi %105, %107 : vector<16x16xi1>
    %c16_i32_14 = arith.constant 16 : i32
    %109 = vector.broadcast %c16_i32_14 : i32 to vector<16x16xi32>
    %110 = arith.cmpi slt, %100, %109 : vector<16x16xi32>
    %111 = arith.andi %108, %110 : vector<16x16xi1>
    %c0_i32_15 = arith.constant 0 : i32
    %c15_i32 = arith.constant 15 : i32
    %112 = vector.broadcast %c0_i32_15 : i32 to vector<16x16xi32>
    %113 = arith.maxsi %112, %96 : vector<16x16xi32>
    %114 = vector.broadcast %c15_i32 : i32 to vector<16x16xi32>
    %115 = arith.minsi %114, %113 : vector<16x16xi32>
    %c0_i32_16 = arith.constant 0 : i32
    %c15_i32_17 = arith.constant 15 : i32
    %116 = vector.broadcast %c0_i32_16 : i32 to vector<16x16xi32>
    %117 = arith.maxsi %116, %100 : vector<16x16xi32>
    %118 = vector.broadcast %c15_i32_17 : i32 to vector<16x16xi32>
    %119 = arith.minsi %118, %117 : vector<16x16xi32>
    %c0_18 = arith.constant 0 : index
    %c0_19 = arith.constant 0 : index
    %c0_20 = arith.constant 0 : index
    %c0_21 = arith.constant 0 : index
    %120 = vector.load %arg6[%c0_18, %c0_19, %c0_20, %c0_21] : memref<1x1x16x16xf32, #tpu.memory_space<vmem>>, vector<1x1x16x16xf32>
    %121 = vector.shape_cast %120 : vector<1x1x16x16xf32> to vector<16x16xf32>
    %122 = tpu.iota {dimensions = array<i32: 2>} : vector<16x16x16xi32>
    %123 = vector.shape_cast %119 : vector<16x16xi32> to vector<16x16x1xi32>
    %124 = vector.broadcast %123 : vector<16x16x1xi32> to vector<16x16x16xi32>
    %125 = arith.cmpi eq, %122, %124 : vector<16x16x16xi32>
    %126 = arith.extui %125 : vector<16x16x16xi1> to vector<16x16x16xi32>
    %127 = arith.sitofp %126 : vector<16x16x16xi32> to vector<16x16x16xf32>
    %128 = vector.shape_cast %121 : vector<16x16xf32> to vector<1x16x16xf32>
    %129 = vector.broadcast %128 : vector<1x16x16xf32> to vector<16x16x16xf32>
    "tpu.trace_start"() <{level = 10 : i32, message = "ywh,yhx->ywx"}> : () -> ()
    %cst_22 = arith.constant dense<0.000000e+00> : vector<16x16x16xf32>
    %130 = tpu.matmul %127, %129, %cst_22 {dimension_numbers = #tpu.dot_dimension_numbers<[2], [1], [1], [2], [0, 0, 0, 1, 1, 2], [0], [0]>} : vector<16x16x16xf32>, vector<16x16x16xf32>, vector<16x16x16xf32> -> vector<16x16x16xf32>
    "tpu.trace_stop"() : () -> ()
    %131 = tpu.iota {dimensions = array<i32: 2>} : vector<16x16x16xi32>
    %132 = vector.shape_cast %115 : vector<16x16xi32> to vector<16x16x1xi32>
    %133 = vector.broadcast %132 : vector<16x16x1xi32> to vector<16x16x16xi32>
    %134 = arith.cmpi eq, %131, %133 : vector<16x16x16xi32>
    %cst_23 = arith.constant 0.000000e+00 : f32
    %135 = vector.broadcast %cst_23 : f32 to vector<16x16x16xf32>
    %136 = arith.select %134, %130, %135 : vector<16x16x16xi1>, vector<16x16x16xf32>
    %cst_24 = arith.constant dense<0.000000e+00> : vector<16x16xf32>
    %137 = vector.multi_reduction <add>, %136, %cst_24 [2] : vector<16x16x16xf32> to vector<16x16xf32>
    %cst_25 = arith.constant 0.000000e+00 : f32
    %138 = vector.broadcast %cst_25 : f32 to vector<16x16xf32>
    %139 = arith.select %111, %137, %138 : vector<16x16xi1>, vector<16x16xf32>
    %cst_26 = arith.constant 1.050000e+00 : f32
    %140 = vector.broadcast %cst_26 : f32 to vector<16x16xf32>
    %141 = arith.mulf %140, %139 : vector<16x16xf32>
    %142 = arith.cmpf olt, %80, %141 : vector<16x16xf32>
    %cst_27 = arith.constant 0.000000e+00 : f32
    %143 = vector.broadcast %cst_27 : f32 to vector<16x16xf32>
    %144 = arith.cmpf ogt, %80, %143 : vector<16x16xf32>
    %145 = arith.andi %142, %144 : vector<16x16xi1>
    %cst_28 = arith.constant 0.000000e+00 : f32
    %146 = vector.broadcast %cst_28 : f32 to vector<16x16xf32>
    %147 = arith.cmpf ogt, %139, %146 : vector<16x16xf32>
    %148 = arith.andi %145, %147 : vector<16x16xi1>
    %c0_29 = arith.constant 0 : index
    %c0_30 = arith.constant 0 : index
    %c0_31 = arith.constant 0 : index
    %149 = vector.load %arg4[%c0_29, %c0_30, %c0_31] : memref<1x16x16xf32, #tpu.memory_space<vmem>>, vector<1x16x16xf32>
    %150 = vector.shape_cast %149 : vector<1x16x16xf32> to vector<16x16xf32>
    %151 = arith.mulf %150, %75 : vector<16x16xf32>
    %152 = vector.broadcast %43 : f32 to vector<16x16xf32>
    %153 = arith.addf %151, %152 : vector<16x16xf32>
    %154 = arith.divf %139, %153 : vector<16x16xf32>
    %155 = math.log %154 : vector<16x16xf32>
    %156 = math.absf %155 : vector<16x16xf32>
    %157 = arith.cmpf one, %156, %156 : vector<16x16xf32>
    %cst_32 = arith.constant dense<true> : vector<16x16xi1>
    %158 = arith.xori %157, %cst_32 : vector<16x16xi1>
    %159 = arith.andi %148, %158 : vector<16x16xi1>
    %cst_33 = arith.constant 0.000000e+00 : f32
    %160 = vector.broadcast %cst_33 : f32 to vector<16x16xf32>
    %161 = arith.select %159, %156, %160 : vector<16x16xi1>, vector<16x16xf32>
    %162 = vector.shape_cast %161 : vector<16x16xf32> to vector<1x16x16xf32>
    %cst_34 = arith.constant dense<0.000000e+00> : vector<1xf32>
    %163 = vector.multi_reduction <add>, %162, %cst_34 [1, 2] : vector<1x16x16xf32> to vector<1xf32>
    %164 = vector.shape_cast %163 : vector<1xf32> to vector<1x1x1xf32>
    %165 = vector.extract %164[0, 0, 0] : f32 from vector<1x1x1xf32>
    %166 = arith.extui %159 : vector<16x16xi1> to vector<16x16xi32>
    %167 = arith.sitofp %166 : vector<16x16xi32> to vector<16x16xf32>
    %168 = vector.shape_cast %167 : vector<16x16xf32> to vector<1x16x16xf32>
    %cst_35 = arith.constant dense<0.000000e+00> : vector<1xf32>
    %169 = vector.multi_reduction <add>, %168, %cst_35 [1, 2] : vector<1x16x16xf32> to vector<1xf32>
    %170 = vector.shape_cast %169 : vector<1xf32> to vector<1x1x1xf32>
    %171 = vector.extract %170[0, 0, 0] : f32 from vector<1x1x1xf32>
    %172 = tpu.iota {dimensions = array<i32: 1>} : vector<1x16x128xi32>
    %c0_36 = arith.constant 0 : index
    %c0_37 = arith.constant 0 : index
    %c0_38 = arith.constant 0 : index
    %173 = vector.load %arg7[%c0_36, %c0_37, %c0_38] : memref<1x16x128xf32, #tpu.memory_space<vmem>>, vector<1x16x128xf32>
    %c8_i32_39 = arith.constant 8 : i32
    %174 = vector.broadcast %c8_i32_39 : i32 to vector<1x16x128xi32>
    %175 = arith.cmpi slt, %172, %174 : vector<1x16x128xi32>
    %176 = vector.broadcast %165 : f32 to vector<1x16x128xf32>
    %177 = vector.broadcast %171 : f32 to vector<1x16x128xf32>
    %178 = arith.select %175, %176, %177 : vector<1x16x128xi1>, vector<1x16x128xf32>
    %179 = arith.addf %173, %178 : vector<1x16x128xf32>
    %c0_40 = arith.constant 0 : index
    %c0_41 = arith.constant 0 : index
    %c0_42 = arith.constant 0 : index
    %180 = vector.load %arg7[%c0_40, %c0_41, %c0_42] : memref<1x16x128xf32, #tpu.memory_space<vmem>>, vector<1x16x128xf32>
    tpu.vector_store %arg7[%c0_40, %c0_41, %c0_42], %179 {strides = array<i32>} : memref<1x16x128xf32, #tpu.memory_space<vmem>>, vector<1x16x128xf32>,
    return
  }
  func.func @transform_0(%arg0: i32, %arg1: i32, %arg2: i32) -> i32 {
    %c0_i32 = arith.constant 0 : i32
    %c0_i32_0 = arith.constant 0 : i32
    return %c0_i32 : i32
  }
  func.func @transform_1(%arg0: i32, %arg1: i32, %arg2: i32) -> (i32, i32, i32) {
    %c0_i32 = arith.constant 0 : i32
    %c0_i32_0 = arith.constant 0 : i32
    return %arg1, %arg2, %c0_i32 : i32, i32, i32
  }
  func.func @transform_2(%arg0: i32, %arg1: i32, %arg2: i32) -> (i32, i32, i32) {
    %c0_i32 = arith.constant 0 : i32
    %c0_i32_0 = arith.constant 0 : i32
    return %arg1, %arg2, %c0_i32 : i32, i32, i32
  }
  func.func @transform_3(%arg0: i32, %arg1: i32, %arg2: i32) -> (i32, i32, i32, i32) {
    %c0_i32 = arith.constant 0 : i32
    %c0_i32_0 = arith.constant 0 : i32
    %c0_i32_1 = arith.constant 0 : i32
    return %arg0, %arg1, %c0_i32, %c0_i32_0 : i32, i32, i32, i32
  }
  func.func @transform_4(%arg0: i32, %arg1: i32, %arg2: i32) -> (i32, i32, i32) {
    %c0_i32 = arith.constant 0 : i32
    %c0_i32_0 = arith.constant 0 : i32
    %c0_i32_1 = arith.constant 0 : i32
    return %arg0, %c0_i32, %c0_i32_0 : i32, i32, i32
  }
}

</mosaic_0001>

<bundles_post_ra>
// kernel: mv_depth_loss.1
= control target key start
LH: loop header
LB: loop body
LE: loop exit
PB: predicated region body
PF: predicated region fallthrough
CT: control target
= control target key end

     0   :  { %9 = vsyncpa [#allocation3], 0  ;;  %s3214_s15 = smov 0   ;;  %s3216_s16 = smov 0   ;;  %s3878_s0 = inlined_call_operand.vmem [shape: f32[48], index: 0, kind: input, shape index: {}]   ;;  %s3879_s1 = inlined_call_operand.vmem [shape: f32[2,16,16], index: 1, kind: input, shape index: {}]   ;;  %s3880_s2 = inlined_call_operand.vmem [shape: f32[2,16,16], index: 2, kind: input, shape index: {}]   ;;  %s3881_s3 = inlined_call_operand.vmem [shape: f32[2,2,16,16], index: 3, kind: input, shape index: {}]   ;;  %s3882_s4 = inlined_call_operand.vmem [shape: f32[2,16,128], index: 4, kind: output, shape index: {}]  }
   0x1   :  { %s3218_s17 = smov 0   ;;  %s3220_s18 = smov 0  }
   0x2   :  { %s3222_s19 = smov 0  }
   0x3 LB: > { %s2774_s20 = sadd.s32 4294967295, %s3183_s19   ;;  %s30_s21 = sadd.s32 1, %s3175_s17  ;;  %s3183_s19 = sphi %s3222_s19, %s15_s19   ;;  %s3179_s18 = sphi %s3220_s18, %s3893_s18   ;;  %s3175_s17 = sphi %s3218_s17, %s3892_s17   ;;  %s3171_s16 = sphi %s3216_s16, %s3891_s16   ;;  %s3167_s15 = sphi %s3214_s15, %s3890_s15  }
   0x4   : > { %p32_p0 = scmp.ge.s32.totalorder %s30_s21, 2  ;;  %s34_s22 = sadd.s32 1, %s3179_s18 }
   0x5   : > { %p2776_p1 = scmp.ge.s32.totalorder %s3183_s19, 1  ;;  %p170_p2 = scmp.lt.s32.totalorder %s3183_s19, 5 }
   0x6   : > { %s3895_s21 = smov (%p32_p0, %s30_s21), 0  ;;  %s3897_s22 = smov (!%p32_p0, %s34_s22), %s3179_s18 }
   0x7   : > { %p3247_p3 = pnand %p2776_p1, %p170_p2  ;;  %p36_p4 = scmp.ge.s32.totalorder %s3897_s22, 2 }
   0x8   : > { %p3251_p5 = scmp.eq.s32.totalorder %s2774_s20, 0  ;;  %s183_s27 = sshll.u32 %s3878_s0, 4  ;;  %s184_s27 = int_to_ptr.vmem [resolvable:$true] %s183_s27 }
   0x9   : > { %p3064_p6 = pneg %p3247_p3  ;;  %s3899_s22 = smov (%p36_p4, %s3897_s22), 0 }
   0xa   : > { %s3126_s28 = scalar_lea.vmem %s184_s27, 16  ;;  %p3134_p12 = scmp.lt.s32.totalorder %s184_s27, %s184_s27 }
   0xb   : > { %p3065_p7 = pnand %p3251_p5, %p3064_p6  ;;  %p3127_p8 = scmp.ne.s32.totalorder %s184_s27, %s3126_s28 }
   0xc   : > { %p3135_p13 = scmp.lt.s32.totalorder %s3126_s28, %s3126_s28 }
   0xd   : > { %p3128_p9 = pneg %p3065_p7 }
   0xe   : > { %p3136_p0 = por %p3135_p13, %p3134_p12 }
   0xf   : > { %p3129_p10 = pnand %p3128_p9, %p3127_p8 }
  0x11   : > { %p3130_p11 = pneg %p3129_p10 }
  0x13   : > { %p3137_p1 = pnand %p3136_p0, %p3130_p11 }
  0x15   : > { %3140 = shalt.err (!%p3137_p1)
}
  0x16   : > { %s3185_s29 = smov [#allocation2]   ;;  %234 = sbr.rel (%p3247_p3) target bundleno = 850 (0x352), region = 36 }
  0x17   : > { %3067 = dma.vmem_to_smem (!%p3065_p7), %s184_s27, 16, %s3185_s29, [#allocation3]  }
  0x1b   : > { %3162 = dma.done.wait (%p3251_p5), [#allocation3], 16  }
  0x1c   : > { %3164 = vsyncadd (%p3251_p5), [#allocation3], 4294967280 }
  0x1d   : > { %240 = sfence }
  0x1e   : > { %p284_p2 = scmp.lt.s32.totalorder %s3167_s15, 1  ;;  %p303_p4 = scmp.lt.s32.totalorder %s3171_s16, 1 }
  0x1f   : > { %p317_p6 = scmp.eq.s32.totalorder %s3167_s15, 0 }
  0x20   : > { %s285_s30 = scalar_select %p284_p2, %s3167_s15, 1  ;;  %v3186_v0 = vmov (%p317_p6), 0.0  }
  0x21   : > { %s304_s5 = scalar_select %p303_p4, %s3171_s16, 1 }
  0x22   : > { %s2864_s6 = sshll.u32 %s285_s30, 4  ;;  %s2785_s7 = sshll.u32 %s285_s30, 1 }
  0x23   : > { %s3278_s10 = scalar_lea.vmem %s3879_s1, %s2864_s6  ;;  %s3283_s13 = scalar_lea.vmem %s3880_s2, %s2864_s6 }
  0x24   : > { %s2786_s14 = sshll.u32 %s304_s5, 2  ;;  %s2866_s20 = sshll.u32 %s304_s5, 4 }
  0x25   : > { %s309_s23 = sadd.s32 %s2786_s14, %s2785_s7  ;;  %s3288_s26 = scalar_lea.vmem %s3882_s4, %s2866_s20 }
  0x26   : > { %s2787_s27 = sshll.u32 %s309_s23, 3  ;;  %322 = sbr.rel (!%p317_p6) target bundleno = 43 (0x2b), region = 44  ;;  %323 = vst [vmem:[%s3288_s26] sm:$0xff] (%p317_p6), %v3186_v0  ;;  %324 = vst [vmem:[%s3288_s26 + $0x8] sm:$0xff] (%p317_p6), %v3186_v0 }
  0x27   : > { %s3293_s30 = scalar_lea.vmem %s3881_s3, %s2787_s27 }
  0x2b PF: > { %s2791_s5 = sshll.u32 %s3171_s16, 1  ;;  %v351_v1 = vlaneseq  ;;  %v3333_v20 = vld [vmem:[%s3283_s13] sm:$0xff]  ;;  %v3354_v32 = vld [vmem:[%s3283_s13 + $0x8] sm:$0xff]  ;;  %vm3883_vm8 = vcmask 130048  }
  0x2c   : > { %s326_s6 = sadd.s32 %s3167_s15, %s2791_s5  ;;  %v3368_v42 = vld [vmem:[%s3293_s30 + $0x8] sm:$0xff]  ;;  %v3376_v46 = vld [vmem:[%s3293_s30] sm:$0xff] }
  0x2d   : > { %s3299_s7 = smul.u32 12, %s326_s6  ;;  %v3301_v2 = vand.u32 127, %v351_v1  ;;  %v3304_v3 = vshrl.u32 %v351_v1, 7  ;;  %2932 = vmatprep.subr.mxu0 %v3368_v42  ;;  %2939 = vmatprep.subr.mxu1 %v3368_v42 }
  0x2e   : > { %2933 = vmatpush3.msra.mxu0 %v3368_v42  ;;  %2940 = vmatpush3.msra.mxu1 %v3368_v42 }
  0x2f   : > { %s333_s8 = sadd.s32 3, %s3299_s7  ;;  %s335_s9 = sadd.s32 4, %s3299_s7  ;;  %v360_v4 = vcvt.s32.f32 %v3301_v2  ;;  %v355_v5 = vadd.s32 8, %v3304_v3  ;;  %v362_v6 = vcvt.s32.f32 %v3304_v3  ;;  %2934 = vmatprep.subr.mxu0 %v3376_v46  ;;  %2941 = vmatprep.subr.mxu1 %v3376_v46  ;;  %v3388_v49 = vsub.s32 1, %v3304_v3 }
  0x30   : > { %s339_s11 = sadd.s32 6, %s3299_s7  ;;  %s3308_s12 = sld [smem:[#allocation2 + %s333_s8]]  ;;  %2935 = vmatpush3.msra.mxu0 %v3376_v46  ;;  %2942 = vmatpush3.msra.mxu1 %v3376_v46  ;;  %v3391_v50 = vsub.s32 0, %v3304_v3  ;;  %v3398_v56 = vsub.s32 2, %v3304_v3  ;;  %v3404_v60 = vsub.s32 3, %v3304_v3  ;;  %v3409_v63 = vsub.s32 4, %v3304_v3 }
  0x31   : > { %s341_s16 = sadd.s32 7, %s3299_s7  ;;  %s340_s15 = sld [smem:[#allocation2 + %s339_s11]]  ;;  %v363_v7 = vcvt.s32.f32 %v355_v5  ;;  %v3318_v8 = vadd.f32 0.5, %v360_v4  ;;  %v3320_v9 = vadd.f32 0.5, %v362_v6  ;;  %2946 = vmatprep.subr.mxu0 %v3368_v42  ;;  %2953 = vmatprep.subr.mxu1 %v3368_v42  ;;  %v3414_v4 = vsub.s32 5, %v3304_v3 }
  0x32   : > { %s343_s14 = sadd.s32 8, %s3299_s7  ;;  %s342_s20 = sld [smem:[#allocation2 + %s341_s16]] }
  0x33   : > { %s344_s23 = sld [smem:[#allocation2 + %s343_s14]]  ;;  %s349_s24 = sadd.s32 11, %s3299_s7  ;;  %v3322_v11 = vadd.f32 0.5, %v363_v7  ;;  %v3422_v7 = vsub.s32 6, %v3304_v3 }
  0x34   : > { %s3316_s25 = sld [smem:[#allocation2 + %s335_s9]]  ;;  %s337_s28 = sadd.s32 5, %s3299_s7 }
  0x35   : > { %s350_s27 = sld [smem:[#allocation2 + %s349_s24]]  ;;  %s347_s5 = sadd.s32 10, %s3299_s7 }
  0x36   : > { %s3328_s29 = sld [smem:[#allocation2 + %s337_s28]]  ;;  %v376_v18 = vstv %s3308_s12  ;;  %s329_s13 = sadd.s32 1, %s3299_s7 }
  0x37   : > { %v386_v10 = vstv %s340_s15  ;;  %v377_v23 = vmul.f32 %v376_v18, %v3318_v8  ;;  %s3350_s6 = sld [smem:[#allocation2 + %s347_s5]]  ;;  %s331_s9 = sadd.s32 2, %s3299_s7 }
  0x38   : > { %v387_v12 = vmul.f32 %v386_v10, %v3318_v8  ;;  %v388_v13 = vstv %s342_s20  ;;  %s328_s30 = sld [smem:[#allocation2 + %s3299_s7]]  ;;  %s345_s12 = sadd.s32 9, %s3299_s7 }
  0x39   : > { %v389_v14 = vmul.f32 %v388_v13, %v3320_v9  ;;  %v393_v15 = vstv %s344_s23  ;;  %v390_v17 = vmul.f32 %v388_v13, %v3322_v11  ;;  %s330_s8 = sld [smem:[#allocation2 + %s329_s13]] }
  0x3a   : > { %v378_v19 = vstv %s3316_s25  ;;  %s3425_s11 = sld [smem:[#allocation2 + %s331_s9]] }
  0x3b   : > { %v391_v16 = vadd.f32 %v389_v14, %v387_v12  ;;  %v3337_v22 = vstv %s350_s27  ;;  %v379_v24 = vmul.f32 %v378_v19, %v3320_v9  ;;  %v392_v26 = vadd.f32 %v390_v17, %v387_v12  ;;  %s3434_s16 = sld [smem:[#allocation2 + %s345_s12]] }
  0x3c   : > { %v383_v31 = vstv %s3328_s29  ;;  %v380_v39 = vmul.f32 %v378_v19, %v3322_v11 }
  0x3d   : > { %v3335_v21 = vadd.f32 %v393_v15, %v391_v16  ;;  %v381_v28 = vadd.f32 %v379_v24, %v377_v23  ;;  %v3348_v30 = vadd.f32 %v393_v15, %v392_v26  ;;  %v418_v37 = vstv %s3350_s6 }
  0x3e   : > { %v382_v44 = vadd.f32 %v380_v39, %v377_v23  ;;  %v366_v10 = vstv %s328_s30  ;;  %v3432_v16 = vsub.s32 7, %v3304_v3 }
  0x3f   : > { %v398_v25 = vmul.f32 %v3333_v20, %v3335_v21  ;;  %v384_v33 = vadd.f32 %v383_v31, %v381_v28  ;;  %v399_v34 = vmul.f32 %v3354_v32, %v3348_v30  ;;  %v367_v13 = vmul.f32 %v366_v10, %v3318_v8 }
  0x40   : > { %v385_v48 = vadd.f32 %v383_v31, %v382_v44  ;;  %v368_v14 = vstv %s330_s8  ;;  %v373_v19 = vstv %s3425_s11 }
  0x41   : > { %v3345_v27 = vadd.f32 %v3337_v22, %v398_v25  ;;  %v416_v35 = vmul.f32 %v3333_v20, %v384_v33  ;;  %v3360_v36 = vadd.f32 %v3337_v22, %v399_v34  ;;  %v369_v17 = vmul.f32 %v368_v14, %v3320_v9 }
  0x42   : > { %v417_v52 = vmul.f32 %v3354_v32, %v385_v48  ;;  %v411_v26 = vstv %s3434_s16  ;;  %v370_v28 = vmul.f32 %v368_v14, %v3322_v11  ;;  %v3187_v14 = vmov 0.0  }
  0x43   : > { %v403_v29 = vadd.f32 1e-08, %v3345_v27  ;;  %v419_v38 = vadd.f32 %v418_v37, %v416_v35  ;;  %v404_v40 = vadd.f32 1e-08, %v3360_v36  ;;  %v371_v18 = vadd.f32 %v369_v17, %v367_v13 }
  0x44   : > { %v420_v57 = vadd.f32 %v418_v37, %v417_v52  ;;  %v372_v9 = vadd.f32 %v370_v28, %v367_v13 }
  0x45   : > { %3114 = vrcp.f32 %v403_v29  ;;  %v374_v23 = vadd.f32 %v373_v19, %v371_v18 }
  0x46   : > { %3116 = vrcp.f32 %v404_v40  ;;  %v375_v35 = vadd.f32 %v373_v19, %v372_v9 }
  0x47   : > { %v409_v25 = vmul.f32 %v3333_v20, %v374_v23 }
  0x48   : > { %v410_v37 = vmul.f32 %v3354_v32, %v375_v35 }
  0x49   : > { %v412_v31 = vadd.f32 %v411_v26, %v409_v25 }
  0x4a   : > { %v413_v39 = vadd.f32 %v411_v26, %v410_v37 }
  0x52   : > { %v3365_v41 = vpop.eup %3114 }
  0x53   : > { %v421_v43 = vmul.f32 %v3365_v41, %v419_v38  ;;  %v3400_v58 = vpop.eup %3116  ;;  %v414_v33 = vmul.f32 %v3365_v41, %v412_v31 }
  0x54   : > { %v422_v61 = vmul.f32 %v3400_v58, %v420_v57 }
  0x55   : > { %v2794_v45 = vadd.f32 -0.5, %v421_v43  ;;  %v2792_v38 = vadd.f32 -0.5, %v414_v33  ;;  %v415_v43 = vmul.f32 %v3400_v58, %v413_v39 }
  0x56   : > { %v2795_v0 = vadd.f32 -0.5, %v422_v61 }
  0x57   : > { %v3380_v47 = vcvt.f32.s32 %v2794_v45  ;;  %v3449_v41 = vcvt.f32.s32 %v2792_v38  ;;  %v2793_v32 = vadd.f32 -0.5, %v415_v43 }
  0x58   : > { %v3416_v5 = vcvt.f32.s32 %v2795_v0 }
  0x59   : > { %vm453_vm0 = vcmp.gt.s32.totalorder %v3380_v47, 0  ;;  %vm445_vm4 = vcmp.gt.s32.totalorder %v3449_v41, 0 }
  0x5a   : > { %v454_v51 = vsel %vm453_vm0, %v3380_v47, 0  ;;  %vm455_vm2 = vcmp.gt.s32.totalorder %v3416_v5, 0  ;;  %v446_v45 = vsel %vm445_vm4, %v3449_v41, 0 }
  0x5b   : > { %vm457_vm1 = vcmp.lt.s32.totalorder %v454_v51, 15  ;;  %v456_v12 = vsel %vm455_vm2, %v3416_v5, 0  ;;  %vm449_vm5 = vcmp.lt.s32.totalorder %v446_v45, 15 }
  0x5c   : > { %v458_v53 = vsel %vm457_vm1, %v454_v51, 15  ;;  %vm459_vm3 = vcmp.lt.s32.totalorder %v456_v12, 15  ;;  %v3456_v51 = vcvt.f32.s32 %v2793_v32 }
  0x5d   : > { %v477_v54 = vrot.slane %v458_v53, %v3388_v49  ;;  %v466_v55 = vrot.slane %v458_v53, %v3391_v50  ;;  %v488_v59 = vrot.slane %v458_v53, %v3398_v56  ;;  %v499_v62 = vrot.slane %v458_v53, %v3404_v60 }
  0x5e   : > { %v510_v1 = vrot.slane %v458_v53, %v3409_v63  ;;  %v521_v6 = vrot.slane %v458_v53, %v3414_v4  ;;  %v532_v15 = vrot.slane %v458_v53, %v3422_v7  ;;  %v543_v8 = vrot.slane %v458_v53, %v3432_v16 }
  0x5f   : > { %479 = vbcast.lane.b32.xlu1 %v477_v54, 256  ;;  %468 = vbcast.lane.b32.xlu0 %v466_v55, 256  ;;  %v460_v24 = vsel %vm459_vm3, %v456_v12, 15  ;;  %vm447_vm6 = vcmp.gt.s32.totalorder %v3456_v51, 0  ;;  %v450_v53 = vsel %vm449_vm5, %v446_v45, 15 }
  0x60   : > { %v554_v29 = vrot.slane %v460_v24, %v3391_v50  ;;  %v565_v34 = vrot.slane %v460_v24, %v3388_v49  ;;  %v576_v20 = vrot.slane %v460_v24, %v3398_v56  ;;  %v587_v11 = vrot.slane %v460_v24, %v3404_v60 }
  0x61   : > { %v598_v40 = vrot.slane %v460_v24, %v3409_v63  ;;  %v609_v44 = vrot.slane %v460_v24, %v3414_v4  ;;  %v620_v48 = vrot.slane %v460_v24, %v3422_v7  ;;  %v631_v52 = vrot.slane %v460_v24, %v3432_v16 }
  0x62   : > { %v2046_v57 = vrot.slane %v450_v53, %v3388_v49  ;;  %v2112_v17 = vrot.slane %v450_v53, %v3432_v16 }
  0x63   : > { %483 = vbcast.lane.b32.xlu1 %v477_v54, 264  ;;  %472 = vbcast.lane.b32.xlu0 %v466_v55, 264  ;;  %v448_v54 = vsel %vm447_vm6, %v3456_v51, 0  ;;  %v2035_v55 = vrot.slane %v450_v53, %v3391_v50 }
  0x64   : > { %vm451_vm7 = vcmp.lt.s32.totalorder %v448_v54, 15 }
  0x65   : > { %v3463_v58 = vsel %vm451_vm7, %v448_v54, 15 }
  0x66   : > { %v2134_v61 = vrot.slane %v3463_v58, %v3388_v49  ;;  %v2145_v0 = vrot.slane %v3463_v58, %v3398_v56  ;;  %v2079_v49 = vrot.slane %v450_v53, %v3409_v63  ;;  %v2178_v10 = vrot.slane %v3463_v58, %v3414_v4 }
  0x67   : > { %490 = vbcast.lane.b32.xlu0 %v488_v59, 256  ;;  %494 = vbcast.lane.b32.xlu1 %v488_v59, 264  ;;  %v2123_v59 = vrot.slane %v3463_v58, %v3391_v50  ;;  %v2156_v50 = vrot.slane %v3463_v58, %v3404_v60  ;;  %v2189_v12 = vrot.slane %v3463_v58, %v3422_v7 }
  0x68   : > { %v2200_v25 = vrot.slane %v3463_v58, %v3432_v16 }
  0x6b   : > { %501 = vbcast.lane.b32.xlu0 %v499_v62, 256  ;;  %505 = vbcast.lane.b32.xlu1 %v499_v62, 264  ;;  %v2057_v62 = vrot.slane %v450_v53, %v3398_v56  ;;  %v2090_v56 = vrot.slane %v450_v53, %v3414_v4 }
  0x6f   : > { %512 = vbcast.lane.b32.xlu0 %v510_v1, 256  ;;  %516 = vbcast.lane.b32.xlu1 %v510_v1, 264  ;;  %v2068_v1 = vrot.slane %v450_v53, %v3404_v60  ;;  %v2101_v60 = vrot.slane %v450_v53, %v3422_v7 }
  0x73   : > { %523 = vbcast.lane.b32.xlu0 %v521_v6, 256  ;;  %527 = vbcast.lane.b32.xlu1 %v521_v6, 264  ;;  %v2167_v6 = vrot.slane %v3463_v58, %v3409_v63 }
  0x77   : > { %534 = vbcast.lane.b32.xlu0 %v532_v15, 256  ;;  %538 = vbcast.lane.b32.xlu1 %v532_v15, 264 }
  0x7b   : > { %545 = vbcast.lane.b32.xlu0 %v543_v8, 256  ;;  %549 = vbcast.lane.b32.xlu1 %v543_v8, 264 }
  0x7f   : > { %556 = vbcast.lane.b32.xlu0 %v554_v29, 256  ;;  %560 = vbcast.lane.b32.xlu1 %v554_v29, 264 }
  0x83   : > { %567 = vbcast.lane.b32.xlu0 %v565_v34, 256  ;;  %571 = vbcast.lane.b32.xlu1 %v565_v34, 264 }
  0x87   : > { %578 = vbcast.lane.b32.xlu0 %v576_v20, 256  ;;  %582 = vbcast.lane.b32.xlu1 %v576_v20, 264 }
  0x8b   : > { %589 = vbcast.lane.b32.xlu0 %v587_v11, 256  ;;  %593 = vbcast.lane.b32.xlu1 %v587_v11, 264 }
  0x8f   : > { %600 = vbcast.lane.b32.xlu0 %v598_v40, 256  ;;  %604 = vbcast.lane.b32.xlu1 %v598_v40, 264 }
  0x93   : > { %611 = vbcast.lane.b32.xlu0 %v609_v44, 256  ;;  %615 = vbcast.lane.b32.xlu1 %v609_v44, 264 }
  0x97   : > { %622 = vbcast.lane.b32.xlu0 %v620_v48, 256  ;;  %626 = vbcast.lane.b32.xlu1 %v620_v48, 264 }
  0x9b   : > { %633 = vbcast.lane.b32.xlu0 %v631_v52, 256  ;;  %637 = vbcast.lane.b32.xlu1 %v631_v52, 264 }
  0x9f   : > { %2037 = vbcast.lane.b32.xlu0 %v2035_v55, 256  ;;  %2041 = vbcast.lane.b32.xlu1 %v2035_v55, 264 }
  0xa3   : > { %2048 = vbcast.lane.b32.xlu0 %v2046_v57, 256  ;;  %2052 = vbcast.lane.b32.xlu1 %v2046_v57, 264 }
  0xa7   : > { %2125 = vbcast.lane.b32.xlu0 %v2123_v59, 256  ;;  %2129 = vbcast.lane.b32.xlu1 %v2123_v59, 264 }
  0xab   : > { %2136 = vbcast.lane.b32.xlu0 %v2134_v61, 256  ;;  %2140 = vbcast.lane.b32.xlu1 %v2134_v61, 264 }
  0xaf   : > { %2059 = vbcast.lane.b32.xlu0 %v2057_v62, 256  ;;  %2063 = vbcast.lane.b32.xlu1 %v2057_v62, 264 }
  0xb3   : > { %2147 = vbcast.lane.b32.xlu0 %v2145_v0, 256  ;;  %2151 = vbcast.lane.b32.xlu1 %v2145_v0, 264 }
  0xb7   : > { %2070 = vbcast.lane.b32.xlu0 %v2068_v1, 256  ;;  %2074 = vbcast.lane.b32.xlu1 %v2068_v1, 264 }
  0xbb   : > { %2158 = vbcast.lane.b32.xlu0 %v2156_v50, 256  ;;  %2162 = vbcast.lane.b32.xlu1 %v2156_v50, 264 }
  0xbf   : > { %2081 = vbcast.lane.b32.xlu0 %v2079_v49, 256  ;;  %2085 = vbcast.lane.b32.xlu1 %v2079_v49, 264 }
  0xc3   : > { %2169 = vbcast.lane.b32.xlu0 %v2167_v6, 256  ;;  %2173 = vbcast.lane.b32.xlu1 %v2167_v6, 264 }
  0xc7   : > { %2092 = vbcast.lane.b32.xlu0 %v2090_v56, 256  ;;  %2096 = vbcast.lane.b32.xlu1 %v2090_v56, 264 }
  0xcb   : > { %2180 = vbcast.lane.b32.xlu0 %v2178_v10, 256  ;;  %2184 = vbcast.lane.b32.xlu1 %v2178_v10, 264 }
  0xcf   : > { %2103 = vbcast.lane.b32.xlu0 %v2101_v60, 256  ;;  %2107 = vbcast.lane.b32.xlu1 %v2101_v60, 264 }
  0xd1   : > { %v480_v13 = vpop.permute.xlu1 %479  ;;  %v469_v63 = vpop.permute.xlu0 %468 }
  0xd2   : > { %vm641_vm9 = vcmp.eq.s32.totalorder %v3301_v2, %v480_v13  ;;  %vm639_vm10 = vcmp.eq.s32.totalorder %v3301_v2, %v469_v63 }
  0xd3   : > { %v2798_v15 = vsel %vm641_vm9, 1.0, %v3187_v14  ;;  %v2796_v4 = vsel %vm639_vm10, 1.0, %v3187_v14  ;;  %2191 = vbcast.lane.b32.xlu0 %v2189_v12, 256  ;;  %2195 = vbcast.lane.b32.xlu1 %v2189_v12, 264 }
  0xd4   : > { %2943 = vmatprep.mubr.msk.f32.mxu1 %vm3883_vm8, %v2798_v15  ;;  %2936 = vmatprep.mubr.msk.f32.mxu0 %vm3883_vm8, %v2796_v4 }
  0xd5   : > { %v484_v7 = vpop.permute.xlu1 %483  ;;  %v473_v18 = vpop.permute.xlu0 %472 }
  0xd6   : > { %vm642_vm11 = vcmp.eq.s32.totalorder %v3301_v2, %v484_v7  ;;  %vm640_vm12 = vcmp.eq.s32.totalorder %v3301_v2, %v473_v18 }
  0xd7   : > { %v2799_v19 = vsel %vm642_vm11, 1.0, %v3187_v14  ;;  %v2797_v8 = vsel %vm640_vm12, 1.0, %v3187_v14  ;;  %2114 = vbcast.lane.b32.xlu0 %v2112_v17, 256  ;;  %2118 = vbcast.lane.b32.xlu1 %v2112_v17, 264 }
  0xd8   : > { %2937 = vmatmul.mubr.msk.f32.vlgmr.msra.gmra.mxu0 %vm3883_vm8, %v2797_v8  ;;  %2944 = vmatmul.mubr.msk.f32.vlgmr.msra.gmra.mxu1 %vm3883_vm8, %v2799_v19 }
  0xd9   : > { %v491_v23 = vpop.permute.xlu0 %490  ;;  %v495_v24 = vpop.permute.xlu1 %494  ;;  %2947 = vmatpush3.msra.mxu0 %v3368_v42  ;;  %2954 = vmatpush3.msra.mxu1 %v3368_v42 }
  0xda   : > { %vm643_vm13 = vcmp.eq.s32.totalorder %v3301_v2, %v491_v23  ;;  %vm644_vm14 = vcmp.eq.s32.totalorder %v3301_v2, %v495_v24  ;;  %2948 = vmatprep.subr.mxu0 %v3376_v46  ;;  %2955 = vmatprep.subr.mxu1 %v3376_v46 }
  0xdb   : > { %v2800_v26 = vsel %vm643_vm13, 1.0, %v3187_v14  ;;  %v2801_v28 = vsel %vm644_vm14, 1.0, %v3187_v14  ;;  %2949 = vmatpush3.msra.mxu0 %v3376_v46  ;;  %2956 = vmatpush3.msra.mxu1 %v3376_v46 }
  0xdc   : > { %2950 = vmatprep.mubr.msk.f32.mxu0 %vm3883_vm8, %v2800_v26  ;;  %2960 = vmatprep.subr.mxu0 %v3368_v42 }
  0xdd   : > { %2951 = vmatmul.mubr.msk.f32.vlgmr.msra.gmra.mxu0 %vm3883_vm8, %v2801_v28  ;;  %v502_v29 = vpop.permute.xlu0 %501  ;;  %v506_v31 = vpop.permute.xlu1 %505  ;;  %2967 = vmatprep.subr.mxu1 %v3368_v42 }
  0xde   : > { %vm645_vm15 = vcmp.eq.s32.totalorder %v3301_v2, %v502_v29  ;;  %vm646_vm0 = vcmp.eq.s32.totalorder %v3301_v2, %v506_v31  ;;  %2961 = vmatpush3.msra.mxu0 %v3368_v42  ;;  %2206 = vbcast.lane.b32.xlu1 %v2200_v25, 264 }
  0xdf   : > { %v2802_v16 = vsel %vm645_vm15, 1.0, %v3187_v14  ;;  %v2803_v9 = vsel %vm646_vm0, 1.0, %v3187_v14  ;;  %2962 = vmatprep.subr.mxu0 %v3376_v46  ;;  %2202 = vbcast.lane.b32.xlu0 %v2200_v25, 256 }
  0xe0   : > { %2957 = vmatprep.mubr.msk.f32.mxu1 %vm3883_vm8, %v2802_v16  ;;  %2963 = vmatpush3.msra.mxu0 %v3376_v46 }
  0xe1   : > { %2958 = vmatmul.mubr.msk.f32.vlgmr.msra.gmra.mxu1 %vm3883_vm8, %v2803_v9  ;;  %v513_v33 = vpop.permute.xlu0 %512  ;;  %v517_v34 = vpop.permute.xlu1 %516  ;;  %2974 = vmatprep.subr.mxu0 %v3368_v42 }
  0xe2   : > { %vm647_vm1 = vcmp.eq.s32.totalorder %v3301_v2, %v513_v33  ;;  %vm648_vm2 = vcmp.eq.s32.totalorder %v3301_v2, %v517_v34  ;;  %2968 = vmatpush3.msra.mxu1 %v3368_v42 }
  0xe3   : > { %v2804_v35 = vsel %vm647_vm1, 1.0, %v3187_v14  ;;  %v2805_v20 = vsel %vm648_vm2, 1.0, %v3187_v14  ;;  %2969 = vmatprep.subr.mxu1 %v3376_v46 }
  0xe4   : > { %2964 = vmatprep.mubr.msk.f32.mxu0 %vm3883_vm8, %v2804_v35  ;;  %2970 = vmatpush3.msra.mxu1 %v3376_v46 }
  0xe5   : > { %2965 = vmatmul.mubr.msk.f32.vlgmr.msra.gmra.mxu0 %vm3883_vm8, %v2805_v20  ;;  %v524_v37 = vpop.permute.xlu0 %523  ;;  %v528_v11 = vpop.permute.xlu1 %527  ;;  %2981 = vmatprep.subr.mxu1 %v3368_v42 }
  0xe6   : > { %vm649_vm3 = vcmp.eq.s32.totalorder %v3301_v2, %v524_v37  ;;  %vm650_vm4 = vcmp.eq.s32.totalorder %v3301_v2, %v528_v11  ;;  %2975 = vmatpush3.msra.mxu0 %v3368_v42 }
  0xe7   : > { %v2806_v38 = vsel %vm649_vm3, 1.0, %v3187_v14  ;;  %v2807_v39 = vsel %vm650_vm4, 1.0, %v3187_v14  ;;  %2976 = vmatprep.subr.mxu0 %v3376_v46 }
  0xe8   : > { %2971 = vmatprep.mubr.msk.f32.mxu1 %vm3883_vm8, %v2806_v38  ;;  %2977 = vmatpush3.msra.mxu0 %v3376_v46 }
  0xe9   : > { %2972 = vmatmul.mubr.msk.f32.vlgmr.msra.gmra.mxu1 %vm3883_vm8, %v2807_v39  ;;  %v535_v40 = vpop.permute.xlu0 %534  ;;  %v539_v43 = vpop.permute.xlu1 %538  ;;  %2988 = vmatprep.subr.mxu0 %v3368_v42 }
  0xea   : > { %vm651_vm5 = vcmp.eq.s32.totalorder %v3301_v2, %v535_v40  ;;  %vm652_vm6 = vcmp.eq.s32.totalorder %v3301_v2, %v539_v43  ;;  %2982 = vmatpush3.msra.mxu1 %v3368_v42 }
  0xeb   : > { %v2808_v44 = vsel %vm651_vm5, 1.0, %v3187_v14  ;;  %v2809_v32 = vsel %vm652_vm6, 1.0, %v3187_v14  ;;  %2983 = vmatprep.subr.mxu1 %v3376_v46 }
  0xec   : > { %2978 = vmatprep.mubr.msk.f32.mxu0 %vm3883_vm8, %v2808_v44  ;;  %2984 = vmatpush3.msra.mxu1 %v3376_v46 }
  0xed   : > { %2979 = vmatmul.mubr.msk.f32.vlgmr.msra.gmra.mxu0 %vm3883_vm8, %v2809_v32  ;;  %v546_v45 = vpop.permute.xlu0 %545  ;;  %v550_v48 = vpop.permute.xlu1 %549  ;;  %2995 = vmatprep.subr.mxu1 %v3368_v42 }
  0xee   : > { %vm653_vm7 = vcmp.eq.s32.totalorder %v3301_v2, %v546_v45  ;;  %vm654_vm9 = vcmp.eq.s32.totalorder %v3301_v2, %v550_v48  ;;  %2989 = vmatpush3.msra.mxu0 %v3368_v42 }
  0xef   : > { %v2810_v52 = vsel %vm653_vm7, 1.0, %v3187_v14  ;;  %v2811_v53 = vsel %vm654_vm9, 1.0, %v3187_v14  ;;  %2990 = vmatprep.subr.mxu0 %v3376_v46 }
  0xf0   : > { %2985 = vmatprep.mubr.msk.f32.mxu1 %vm3883_vm8, %v2810_v52  ;;  %2991 = vmatpush3.msra.mxu0 %v3376_v46 }
  0xf1   : > { %2986 = vmatmul.mubr.msk.f32.vlgmr.msra.gmra.mxu1 %vm3883_vm8, %v2811_v53  ;;  %v557_v54 = vpop.permute.xlu0 %556  ;;  %v561_v55 = vpop.permute.xlu1 %560  ;;  %3002 = vmatprep.subr.mxu0 %v3368_v42 }
  0xf2   : > { %vm655_vm10 = vcmp.eq.s32.totalorder %v3301_v2, %v557_v54  ;;  %vm656_vm11 = vcmp.eq.s32.totalorder %v3301_v2, %v561_v55  ;;  %2996 = vmatpush3.msra.mxu1 %v3368_v42 }
  0xf3   : > { %v2812_v57 = vsel %vm655_vm10, 1.0, %v3187_v14  ;;  %v2813_v58 = vsel %vm656_vm11, 1.0, %v3187_v14  ;;  %2997 = vmatprep.subr.mxu1 %v3376_v46 }
  0xf4   : > { %2992 = vmatprep.mubr.msk.f32.mxu0 %vm3883_vm8, %v2812_v57  ;;  %2998 = vmatpush3.msra.mxu1 %v3376_v46 }
  0xf5   : > { %2993 = vmatmul.mubr.msk.f32.vlgmr.msra.gmra.mxu0 %vm3883_vm8, %v2813_v58  ;;  %v568_v59 = vpop.permute.xlu0 %567  ;;  %v572_v61 = vpop.permute.xlu1 %571  ;;  %3009 = vmatprep.subr.mxu1 %v3368_v42 }
  0xf6   : > { %vm657_vm12 = vcmp.eq.s32.totalorder %v3301_v2, %v568_v59  ;;  %vm658_vm13 = vcmp.eq.s32.totalorder %v3301_v2, %v572_v61  ;;  %3003 = vmatpush3.msra.mxu0 %v3368_v42 }
  0xf7   : > { %v2814_v62 = vsel %vm657_vm12, 1.0, %v3187_v14  ;;  %v2815_v0 = vsel %vm658_vm13, 1.0, %v3187_v14  ;;  %3004 = vmatprep.subr.mxu0 %v3376_v46 }
  0xf8   : > { %2999 = vmatprep.mubr.msk.f32.mxu1 %vm3883_vm8, %v2814_v62  ;;  %3005 = vmatpush3.msra.mxu0 %v3376_v46 }
  0xf9   : > { %3000 = vmatmul.mubr.msk.f32.vlgmr.msra.gmra.mxu1 %vm3883_vm8, %v2815_v0  ;;  %v579_v1 = vpop.permute.xlu0 %578  ;;  %v583_v50 = vpop.permute.xlu1 %582  ;;  %3016 = vmatprep.subr.mxu0 %v3368_v42 }
  0xfa   : > { %vm659_vm14 = vcmp.eq.s32.totalorder %v3301_v2, %v579_v1  ;;  %vm660_vm15 = vcmp.eq.s32.totalorder %v3301_v2, %v583_v50  ;;  %3010 = vmatpush3.msra.mxu1 %v3368_v42 }
  0xfb   : > { %v2816_v49 = vsel %vm659_vm14, 1.0, %v3187_v14  ;;  %v2817_v6 = vsel %vm660_vm15, 1.0, %v3187_v14  ;;  %3011 = vmatprep.subr.mxu1 %v3376_v46 }
  0xfc   : > { %3006 = vmatprep.mubr.msk.f32.mxu0 %vm3883_vm8, %v2816_v49  ;;  %3012 = vmatpush3.msra.mxu1 %v3376_v46 }
  0xfd   : > { %3007 = vmatmul.mubr.msk.f32.vlgmr.msra.gmra.mxu0 %vm3883_vm8, %v2817_v6  ;;  %v590_v56 = vpop.permute.xlu0 %589  ;;  %v594_v10 = vpop.permute.xlu1 %593  ;;  %3023 = vmatprep.subr.mxu1 %v3368_v42 }
  0xfe   : > { %vm661_vm0 = vcmp.eq.s32.totalorder %v3301_v2, %v590_v56  ;;  %vm662_vm1 = vcmp.eq.s32.totalorder %v3301_v2, %v594_v10  ;;  %3017 = vmatpush3.msra.mxu0 %v3368_v42 }
  0xff   : > { %v2818_v60 = vsel %vm661_vm0, 1.0, %v3187_v14  ;;  %v2819_v12 = vsel %vm662_vm1, 1.0, %v3187_v14  ;;  %3018 = vmatprep.subr.mxu0 %v3376_v46 }
 0x100   : > { %3013 = vmatprep.mubr.msk.f32.mxu1 %vm3883_vm8, %v2818_v60  ;;  %3019 = vmatpush3.msra.mxu0 %v3376_v46 }
 0x101   : > { %3014 = vmatmul.mubr.msk.f32.vlgmr.msra.gmra.mxu1 %vm3883_vm8, %v2819_v12  ;;  %v601_v13 = vpop.permute.xlu0 %600  ;;  %v605_v63 = vpop.permute.xlu1 %604  ;;  %3030 = vmatprep.subr.mxu0 %v3368_v42 }
 0x102   : > { %vm663_vm2 = vcmp.eq.s32.totalorder %v3301_v2, %v601_v13  ;;  %vm664_vm3 = vcmp.eq.s32.totalorder %v3301_v2, %v605_v63  ;;  %3024 = vmatpush3.msra.mxu1 %v3368_v42 }
 0x103   : > { %v2820_v15 = vsel %vm663_vm2, 1.0, %v3187_v14  ;;  %v2821_v4 = vsel %vm664_vm3, 1.0, %v3187_v14  ;;  %3025 = vmatprep.subr.mxu1 %v3376_v46 }
 0x104   : > { %3020 = vmatprep.mubr.msk.f32.mxu0 %vm3883_vm8, %v2820_v15  ;;  %3026 = vmatpush3.msra.mxu1 %v3376_v46 }
 0x105   : > { %3021 = vmatmul.mubr.msk.f32.vlgmr.msra.gmra.mxu0 %vm3883_vm8, %v2821_v4  ;;  %v612_v17 = vpop.permute.xlu0 %611  ;;  %v616_v7 = vpop.permute.xlu1 %615  ;;  %3037 = vmatprep.subr.mxu1 %v3368_v42 }
 0x106   : > { %vm665_vm4 = vcmp.eq.s32.totalorder %v3301_v2, %v612_v17  ;;  %vm666_vm5 = vcmp.eq.s32.totalorder %v3301_v2, %v616_v7  ;;  %3031 = vmatpush3.msra.mxu0 %v3368_v42 }
 0x107   : > { %v2822_v18 = vsel %vm665_vm4, 1.0, %v3187_v14  ;;  %v2823_v19 = vsel %vm666_vm5, 1.0, %v3187_v14  ;;  %3032 = vmatprep.subr.mxu0 %v3376_v46 }
 0x108   : > { %3027 = vmatprep.mubr.msk.f32.mxu1 %vm3883_vm8, %v2822_v18  ;;  %3033 = vmatpush3.msra.mxu0 %v3376_v46 }
 0x109   : > { %3028 = vmatmul.mubr.msk.f32.vlgmr.msra.gmra.mxu1 %vm3883_vm8, %v2823_v19  ;;  %v623_v8 = vpop.permute.xlu0 %622  ;;  %v627_v23 = vpop.permute.xlu1 %626 }
 0x10a   : > { %vm667_vm6 = vcmp.eq.s32.totalorder %v3301_v2, %v623_v8  ;;  %vm668_vm7 = vcmp.eq.s32.totalorder %v3301_v2, %v627_v23  ;;  %3038 = vmatpush3.msra.mxu1 %v3368_v42 }
 0x10b   : > { %v2824_v24 = vsel %vm667_vm6, 1.0, %v3187_v14  ;;  %v2825_v25 = vsel %vm668_vm7, 1.0, %v3187_v14  ;;  %3039 = vmatprep.subr.mxu1 %v3376_v46 }
 0x10c   : > { %3034 = vmatprep.mubr.msk.f32.mxu0 %vm3883_vm8, %v2824_v24  ;;  %3040 = vmatpush3.msra.mxu1 %v3376_v46 }
 0x10d   : > { %3035 = vmatmul.mubr.msk.f32.vlgmr.msra.gmra.mxu0 %vm3883_vm8, %v2825_v25  ;;  %v634_v26 = vpop.permute.xlu0 %633  ;;  %v638_v28 = vpop.permute.xlu1 %637 }
 0x10e   : > { %vm669_vm9 = vcmp.eq.s32.totalorder %v3301_v2, %v634_v26  ;;  %vm670_vm10 = vcmp.eq.s32.totalorder %v3301_v2, %v638_v28 }
 0x10f   : > { %v2826_v42 = vsel %vm669_vm9, 1.0, %v3187_v14  ;;  %v2827_v29 = vsel %vm670_vm10, 1.0, %v3187_v14 }
 0x110   : > { %3041 = vmatprep.mubr.msk.f32.mxu1 %vm3883_vm8, %v2826_v42 }
 0x111   : > { %3042 = vmatmul.mubr.msk.f32.vlgmr.msra.gmra.mxu1 %vm3883_vm8, %v2827_v29  ;;  %v2038_v31 = vpop.permute.xlu0 %2037  ;;  %v2042_v16 = vpop.permute.xlu1 %2041 }
 0x112   : > { %vm2209_vm11 = vcmp.eq.s32.totalorder %v3301_v2, %v2042_v16  ;;  %vm2208_vm13 = vcmp.eq.s32.totalorder %v3301_v2, %v2038_v31 }
 0x115   : > { %v2049_v9 = vpop.permute.xlu0 %2048  ;;  %v2053_v46 = vpop.permute.xlu1 %2052 }
 0x116   : > { %vm2211_vm12 = vcmp.eq.s32.totalorder %v3301_v2, %v2053_v46  ;;  %vm2210_vm14 = vcmp.eq.s32.totalorder %v3301_v2, %v2049_v9 }
 0x119   : > { %v3637_v33 = vpop.permute.xlu0 %2125  ;;  %v3639_v34 = vpop.permute.xlu1 %2129 }
 0x11d   : > { %v3641_v35 = vpop.permute.xlu0 %2136  ;;  %v3643_v20 = vpop.permute.xlu1 %2140 }
 0x121   : > { %v2060_v37 = vpop.permute.xlu0 %2059  ;;  %v2064_v11 = vpop.permute.xlu1 %2063 }
 0x122   : > { %vm2212_vm15 = vcmp.eq.s32.totalorder %v3301_v2, %v2060_v37  ;;  %vm2213_vm0 = vcmp.eq.s32.totalorder %v3301_v2, %v2064_v11 }
 0x125   : > { %v3645_v38 = vpop.permute.xlu0 %2147  ;;  %v3647_v39 = vpop.permute.xlu1 %2151 }
 0x129   : > { %v2071_v40 = vpop.permute.xlu0 %2070  ;;  %v2075_v43 = vpop.permute.xlu1 %2074 }
 0x12a   : > { %vm2214_vm1 = vcmp.eq.s32.totalorder %v3301_v2, %v2071_v40  ;;  %vm2215_vm2 = vcmp.eq.s32.totalorder %v3301_v2, %v2075_v43 }
 0x12d   : > { %v3649_v44 = vpop.permute.xlu0 %2158  ;;  %v3651_v32 = vpop.permute.xlu1 %2162 }
 0x131   : > { %v2082_v45 = vpop.permute.xlu0 %2081  ;;  %v2086_v48 = vpop.permute.xlu1 %2085 }
 0x132   : > { %vm2216_vm3 = vcmp.eq.s32.totalorder %v3301_v2, %v2082_v45  ;;  %vm2217_vm4 = vcmp.eq.s32.totalorder %v3301_v2, %v2086_v48 }
 0x135   : > { %v3653_v52 = vpop.permute.xlu0 %2169  ;;  %v3655_v53 = vpop.permute.xlu1 %2173 }
 0x139   : > { %v2093_v54 = vpop.permute.xlu0 %2092  ;;  %v2097_v61 = vpop.permute.xlu1 %2096 }
 0x13a   : > { %vm2218_vm5 = vcmp.eq.s32.totalorder %v3301_v2, %v2093_v54  ;;  %vm2219_vm6 = vcmp.eq.s32.totalorder %v3301_v2, %v2097_v61 }
 0x13d   : > { %v3662_v6 = vpop.permute.xlu0 %2180  ;;  %v3667_v13 = vpop.permute.xlu1 %2184 }
 0x141   : > { %v2104_v7 = vpop.permute.xlu0 %2103  ;;  %v2108_v25 = vpop.permute.xlu1 %2107 }
 0x142   : > { %vm2220_vm7 = vcmp.eq.s32.totalorder %v3301_v2, %v2104_v7  ;;  %vm2221_vm9 = vcmp.eq.s32.totalorder %v3301_v2, %v2108_v25 }
 0x145   : > { %v3677_v31 = vpop.permute.xlu0 %2191  ;;  %v3683_v40 = vpop.permute.xlu1 %2195 }
 0x149   : > { %v2119_v61 = vpop.permute.xlu1 %2118 }
 0x198   : > { %v2938_v55 = vpop.f32.mrf.mxu0  ;;  %v2945_v57 = vpop.f32.mrf.mxu1 }
 0x199   : > { %v2241_v58 = vsel %vm2209_vm11, %v2938_v55, 0.0  ;;  %v2243_v59 = vsel %vm2211_vm12, %v2945_v57, 0.0  ;;  %v2115_v57 = vpop.permute.xlu0 %2114  ;;  %vm2223_vm11 = vcmp.eq.s32.totalorder %v3301_v2, %v2119_v61  ;;  %vm2224_vm12 = vcmp.eq.s32.totalorder %v3301_v2, %v3637_v33 }
 0x19a   : > { %v808_v62 = vpop.f32.mrf.mxu0  ;;  %v2275_v0 = vsel %vm3883_vm8, %v2241_v58, 0.0  ;;  %v2281_v1 = vsel %vm3883_vm8, %v2243_v59, 0.0  ;;  %v889_v49 = vpop.f32.mrf.mxu1  ;;  %vm2222_vm10 = vcmp.eq.s32.totalorder %v3301_v2, %v2115_v57 }
 0x19b   : > { %v2240_v50 = vsel %vm2208_vm13, %v808_v62, 0.0  ;;  %2276 = vadd.xlane.f32.xlu1 %v2275_v0  ;;  %2282 = vadd.xlane.f32.xlu0 %v2281_v1  ;;  %v2242_v60 = vsel %vm2210_vm14, %v889_v49, 0.0  ;;  %vm2225_vm13 = vcmp.eq.s32.totalorder %v3301_v2, %v3639_v34  ;;  %vm2226_vm14 = vcmp.eq.s32.totalorder %v3301_v2, %v3641_v35 }
 0x19c   : > { %v2272_v10 = vsel %vm3883_vm8, %v2240_v50, 0.0  ;;  %v2278_v17 = vsel %vm3883_vm8, %v2242_v60, 0.0 }
 0x19d   : > { %v2952_v56 = vpop.f32.mrf.mxu0 }
 0x19e   : > { %v2245_v18 = vsel %vm2213_vm0, %v2952_v56, 0.0  ;;  %vm2228_vm0 = vcmp.eq.s32.totalorder %v3301_v2, %v3645_v38 }
 0x19f   : > { %v970_v12 = vpop.f32.mrf.mxu0  ;;  %2273 = vadd.xlane.f32.xlu0 %v2272_v10  ;;  %v2287_v26 = vsel %vm3883_vm8, %v2245_v18, 0.0 }
 0x1a0   : > { %v2244_v63 = vsel %vm2212_vm15, %v970_v12, 0.0  ;;  %vm2227_vm15 = vcmp.eq.s32.totalorder %v3301_v2, %v3643_v20 }
 0x1a1   : > { %v2959_v15 = vpop.f32.mrf.mxu1  ;;  %v2284_v4 = vsel %vm3883_vm8, %v2244_v63, 0.0 }
 0x1a2   : > { %2285 = vadd.xlane.f32.xlu1 %v2284_v4  ;;  %v2247_v28 = vsel %vm2215_vm2, %v2959_v15, 0.0  ;;  %vm2230_vm2 = vcmp.eq.s32.totalorder %v3301_v2, %v3649_v44 }
 0x1a3   : > { %v1051_v19 = vpop.f32.mrf.mxu1  ;;  %2279 = vadd.xlane.f32.xlu0 %v2278_v17  ;;  %v2293_v46 = vsel %vm3883_vm8, %v2247_v28, 0.0 }
 0x1a4   : > { %v2246_v8 = vsel %vm2214_vm1, %v1051_v19, 0.0  ;;  %vm2229_vm1 = vcmp.eq.s32.totalorder %v3301_v2, %v3647_v39 }
 0x1a5   : > { %v2966_v23 = vpop.f32.mrf.mxu0  ;;  %v2290_v24 = vsel %vm3883_vm8, %v2246_v8, 0.0 }
 0x1a6   : > { %2291 = vadd.xlane.f32.xlu1 %v2290_v24  ;;  %v2249_v37 = vsel %vm2217_vm4, %v2966_v23, 0.0  ;;  %vm2232_vm4 = vcmp.eq.s32.totalorder %v3301_v2, %v3653_v52 }
 0x1a7   : > { %v1132_v42 = vpop.f32.mrf.mxu0  ;;  %2288 = vadd.xlane.f32.xlu0 %v2287_v26  ;;  %v2299_v48 = vsel %vm3883_vm8, %v2249_v37, 0.0 }
 0x1a8   : > { %v2248_v29 = vsel %vm2216_vm3, %v1132_v42, 0.0  ;;  %vm2231_vm3 = vcmp.eq.s32.totalorder %v3301_v2, %v3651_v32 }
 0x1a9   : > { %v2973_v16 = vpop.f32.mrf.mxu1  ;;  %v2296_v9 = vsel %vm3883_vm8, %v2248_v29, 0.0 }
 0x1aa   : > { %2297 = vadd.xlane.f32.xlu1 %v2296_v9  ;;  %v2251_v58 = vsel %vm2219_vm6, %v2973_v16, 0.0  ;;  %vm2234_vm6 = vcmp.eq.s32.totalorder %v3301_v2, %v3662_v6 }
 0x1ab   : > { %v1213_v11 = vpop.f32.mrf.mxu1  ;;  %2294 = vadd.xlane.f32.xlu0 %v2293_v46  ;;  %v2305_v1 = vsel %vm3883_vm8, %v2251_v58, 0.0 }
 0x1ac   : > { %v2250_v43 = vsel %vm2218_vm5, %v1213_v11, 0.0  ;;  %vm2233_vm5 = vcmp.eq.s32.totalorder %v3301_v2, %v3655_v53  ;;  %v2203_v53 = vpop.permute.xlu0 %2202 }
 0x1ad   : > { %v2980_v45 = vpop.f32.mrf.mxu0  ;;  %v2302_v55 = vsel %vm3883_vm8, %v2250_v43, 0.0 }
 0x1ae   : > { %2303 = vadd.xlane.f32.xlu1 %v2302_v55  ;;  %v2253_v49 = vsel %vm2221_vm9, %v2980_v45, 0.0  ;;  %vm2236_vm9 = vcmp.eq.s32.totalorder %v3301_v2, %v3677_v31 }
 0x1af   : > { %v1294_v59 = vpop.f32.mrf.mxu0  ;;  %2300 = vadd.xlane.f32.xlu0 %v2299_v48  ;;  %v2311_v12 = vsel %vm3883_vm8, %v2253_v49, 0.0 }
 0x1b0   : > { %v2252_v54 = vsel %vm2220_vm7, %v1294_v59, 0.0  ;;  %vm2235_vm7 = vcmp.eq.s32.totalorder %v3301_v2, %v3667_v13 }
 0x1b1   : > { %v2987_v62 = vpop.f32.mrf.mxu1  ;;  %v2308_v0 = vsel %vm3883_vm8, %v2252_v54, 0.0 }
 0x1b2   : > { %2309 = vadd.xlane.f32.xlu1 %v2308_v0  ;;  %v2255_v15 = vsel %vm2223_vm11, %v2987_v62, 0.0  ;;  %vm2237_vm11 = vcmp.eq.s32.totalorder %v3301_v2, %v3683_v40 }
 0x1b3   : > { %v1375_v50 = vpop.f32.mrf.mxu1  ;;  %2306 = vadd.xlane.f32.xlu0 %v2305_v1  ;;  %v2317_v18 = vsel %vm3883_vm8, %v2255_v15, 0.0  ;;  %v2207_v1 = vpop.permute.xlu1 %2206 }
 0x1b4   : > { %v2254_v56 = vsel %vm2222_vm10, %v1375_v50, 0.0  ;;  %vm2238_vm10 = vcmp.eq.s32.totalorder %v3301_v2, %v2203_v53 }
 0x1b5   : > { %v2994_v10 = vpop.f32.mrf.mxu0  ;;  %v2314_v60 = vsel %vm3883_vm8, %v2254_v56, 0.0 }
 0x1b6   : > { %2315 = vadd.xlane.f32.xlu1 %v2314_v60  ;;  %v2257_v19 = vsel %vm2225_vm13, %v2994_v10, 0.0  ;;  %vm2409_vm13 = vcmask 130112  }
 0x1b7   : > { %v1456_v63 = vpop.f32.mrf.mxu0  ;;  %2312 = vadd.xlane.f32.xlu0 %v2311_v12  ;;  %v2323_v25 = vsel %vm3883_vm8, %v2257_v19, 0.0 }
 0x1b8   : > { %v2256_v4 = vsel %vm2224_vm12, %v1456_v63, 0.0  ;;  %vm2239_vm12 = vcmp.eq.s32.totalorder %v3301_v2, %v2207_v1 }
 0x1b9   : > { %v3001_v17 = vpop.f32.mrf.mxu1  ;;  %v2320_v7 = vsel %vm3883_vm8, %v2256_v4, 0.0 }
 0x1ba   : > { %2321 = vadd.xlane.f32.xlu1 %v2320_v7  ;;  %v2259_v34 = vsel %vm2227_vm15, %v3001_v17, 0.0  ;;  %vm2548_vm15 = vcmask 1042434  }
 0x1bb   : > { %v1537_v8 = vpop.f32.mrf.mxu1  ;;  %2318 = vadd.xlane.f32.xlu0 %v2317_v18  ;;  %v2329_v29 = vsel %vm3883_vm8, %v2259_v34, 0.0  ;;  %v2583_v34 = vld [vmem:[%s3278_s10] sm:$0xff] }
 0x1bc   : > { %v2258_v33 = vsel %vm2226_vm14, %v1537_v8, 0.0  ;;  %vm2546_vm14 = vcmask 1041409  }
 0x1bd   : > { %v3008_v23 = vpop.f32.mrf.mxu0  ;;  %v2326_v24 = vsel %vm3883_vm8, %v2258_v33, 0.0 }
 0x1be   : > { %2327 = vadd.xlane.f32.xlu1 %v2326_v24  ;;  %v2261_v20 = vsel %vm2229_vm1, %v3008_v23, 0.0  ;;  %vm431_vm1 = vcmp.ge.s32.totalorder %v3449_v41, 0 }
 0x1bf   : > { %v1618_v26 = vpop.f32.mrf.mxu0  ;;  %2324 = vadd.xlane.f32.xlu0 %v2323_v25  ;;  %v2335_v37 = vsel %vm3883_vm8, %v2261_v20, 0.0 }
 0x1c0   : > { %v2260_v35 = vsel %vm2228_vm0, %v1618_v26, 0.0  ;;  %vm2550_vm0 = vcmask 1043459  }
 0x1c1   : > { %v3015_v28 = vpop.f32.mrf.mxu1  ;;  %v2332_v42 = vsel %vm3883_vm8, %v2260_v35, 0.0 }
 0x1c2   : > { %2333 = vadd.xlane.f32.xlu1 %v2332_v42  ;;  %v2263_v39 = vsel %vm2231_vm3, %v3015_v28, 0.0  ;;  %v2404_v28 = vadd.s32 4294967288, %v3301_v2  ;;  %v2585_v42 = vmul.f32 %v2583_v34, %v3335_v21  ;;  %vm2552_vm3 = vcmask 1044484  }
 0x1c3   : > { %v1699_v16 = vpop.f32.mrf.mxu1  ;;  %2330 = vadd.xlane.f32.xlu0 %v2329_v29  ;;  %v2341_v55 = vsel %vm3883_vm8, %v2263_v39, 0.0 }
 0x1c4   : > { %v2262_v38 = vsel %vm2230_vm2, %v1699_v16, 0.0  ;;  %v3749_v16 = vsub.s32 %v2404_v28, %v3304_v3  ;;  %vm433_vm2 = vcmp.lt.s32.totalorder %v3449_v41, 16 }
 0x1c5   : > { %v3022_v9 = vpop.f32.mrf.mxu0  ;;  %v2338_v46 = vsel %vm3883_vm8, %v2262_v38, 0.0  ;;  %v3753_v38 = vsub.s32 %v3301_v2, %v3304_v3 }
 0x1c6   : > { %2339 = vadd.xlane.f32.xlu1 %v2338_v46  ;;  %v2265_v32 = vsel %vm2233_vm5, %v3022_v9, 0.0  ;;  %v2587_v9 = vadd.f32 %v2585_v42, %v3337_v22  ;;  %vm435_vm5 = vmand %vm431_vm1, %vm433_vm2  ;;  %vm432_vm1 = vcmp.ge.s32.totalorder %v3456_v51, 0  ;;  %vm434_vm2 = vcmp.lt.s32.totalorder %v3456_v51, 16 }
 0x1c7   : > { %v1780_v11 = vpop.f32.mrf.mxu0  ;;  %2336 = vadd.xlane.f32.xlu0 %v2335_v37  ;;  %v2347_v59 = vsel %vm3883_vm8, %v2265_v32, 0.0 }
 0x1c8   : > { %v2264_v44 = vsel %vm2232_vm4, %v1780_v11, 0.0  ;;  %3118 = vrcp.f32 %v2587_v9  ;;  %vm437_vm4 = vcmp.ge.s32.totalorder %v3380_v47, 0 }
 0x1c9   : > { %v3029_v43 = vpop.f32.mrf.mxu1  ;;  %v2344_v45 = vsel %vm3883_vm8, %v2264_v44, 0.0 }
 0x1ca   : > { %2345 = vadd.xlane.f32.xlu1 %v2344_v45  ;;  %v2267_v54 = vsel %vm2235_vm7, %v3029_v43, 0.0  ;;  %vm2556_vm7 = vcmask 1046534  }
 0x1cb   : > { %v1861_v48 = vpop.f32.mrf.mxu1  ;;  %2342 = vadd.xlane.f32.xlu0 %v2341_v55  ;;  %v2353_v13 = vsel %vm3883_vm8, %v2267_v54, 0.0 }
 0x1cc   : > { %v2266_v52 = vsel %vm2234_vm6, %v1861_v48, 0.0  ;;  %vm2554_vm6 = vcmask 1045509  }
 0x1cd   : > { %v3036_v57 = vpop.f32.mrf.mxu0  ;;  %v2350_v58 = vsel %vm3883_vm8, %v2266_v52, 0.0 }
 0x1ce   : > { %2351 = vadd.xlane.f32.xlu1 %v2350_v58  ;;  %v2269_v50 = vsel %vm2237_vm11, %v3036_v57, 0.0  ;;  %vm439_vm11 = vmand %vm435_vm5, %vm437_vm4  ;;  %vm438_vm5 = vcmp.ge.s32.totalorder %v3416_v5, 0 }
 0x1cf   : > { %v1942_v62 = vpop.f32.mrf.mxu0  ;;  %2348 = vadd.xlane.f32.xlu0 %v2347_v59  ;;  %v2359_v10 = vsel %vm3883_vm8, %v2269_v50, 0.0  ;;  %vm436_vm4 = vmand %vm432_vm1, %vm434_vm2 }
 0x1d0   : > { %v2268_v6 = vsel %vm2236_vm9, %v1942_v62, 0.0  ;;  %vm441_vm9 = vcmp.lt.s32.totalorder %v3380_v47, 16 }
 0x1d1   : > { %v2356_v0 = vsel %vm3883_vm8, %v2268_v6, 0.0  ;;  %v3043_v61 = vpop.f32.mrf.mxu1 }
 0x1d2   : > { %2357 = vadd.xlane.f32.xlu1 %v2356_v0  ;;  %v2271_v60 = vsel %vm2239_vm12, %v3043_v61, 0.0  ;;  %vm443_vm12 = vmand %vm439_vm11, %vm441_vm9  ;;  %vm442_vm11 = vcmp.lt.s32.totalorder %v3416_v5, 16 }
 0x1d3   : > { %2354 = vadd.xlane.f32.xlu0 %v2353_v13  ;;  %v2023_v49 = vpop.f32.mrf.mxu1  ;;  %v2365_v12 = vsel %vm3883_vm8, %v2271_v60, 0.0  ;;  %vm440_vm9 = vmand %vm436_vm4, %vm438_vm5 }
 0x1d4   : > { %v2270_v31 = vsel %vm2238_vm10, %v2023_v49, 0.0  ;;  %vm2558_vm10 = vcmask 1047559  }
 0x1d5   : > { %v2362_v56 = vsel %vm3883_vm8, %v2270_v31, 0.0 }
 0x1d6   : > { %2363 = vadd.xlane.f32.xlu1 %v2362_v56 }
 0x1d7   : > { %2360 = vadd.xlane.f32.xlu0 %v2359_v10  ;;  %v2584_v10 = vld [vmem:[%s3278_s10 + $0x8] sm:$0xff] }
 0x1db   : > { %2366 = vadd.xlane.f32.xlu0 %v2365_v12 }
 0x224   : > { %v2283_v40 = vpop.xlane.xlu0 %2282  ;;  %v2277_v63 = vpop.xlane.xlu1 %2276 }
 0x225   : > { %v2418_v11 = vrot.slane %v2283_v40, %v3749_v16  ;;  %v2408_v45 = vrot.slane %v2277_v63, %v3749_v16 }
 0x228   : > { %v2274_v15 = vpop.xlane.xlu0 %2273 }
 0x229   : > { %v2403_v44 = vrot.slane %v2274_v15, %v3753_v38 }
 0x22b   : > { %v2286_v4 = vpop.xlane.xlu1 %2285  ;;  %v2410_v54 = vsel %vm2409_vm13, %v2408_v45, %v2403_v44 }
 0x22c   : > { %v2280_v17 = vpop.xlane.xlu0 %2279  ;;  %v2423_v3 = vrot.slane %v2286_v4, %v3753_v38  ;;  %v2586_v4 = vmul.f32 %v2584_v10, %v3348_v30 }
 0x22d   : > { %v2414_v46 = vrot.slane %v2280_v17, %v3753_v38 }
 0x22f   : > { %v2292_v7 = vpop.xlane.xlu1 %2291  ;;  %v2419_v55 = vsel %vm2409_vm13, %v2418_v11, %v2414_v46 }
 0x230   : > { %v2289_v18 = vpop.xlane.xlu0 %2288  ;;  %v2432_v32 = vrot.slane %v2292_v7, %v3753_v38  ;;  %v2547_v61 = vsel %vm2546_vm14, %v2419_v55, %v2410_v54 }
 0x231   : > { %v2427_v21 = vrot.slane %v2289_v18, %v3749_v16 }
 0x233   : > { %v2298_v19 = vpop.xlane.xlu1 %2297  ;;  %v2428_v57 = vsel %vm2409_vm13, %v2427_v21, %v2423_v3 }
 0x234   : > { %v2295_v8 = vpop.xlane.xlu0 %2294  ;;  %v2441_v58 = vrot.slane %v2298_v19, %v3753_v38  ;;  %v2549_v50 = vsel %vm2548_vm15, %v2428_v57, %v2547_v61 }
 0x235   : > { %v2436_v2 = vrot.slane %v2295_v8, %v3749_v16  ;;  %v3119_v8 = vpop.eup %3118 }
 0x237   : > { %v2304_v33 = vpop.xlane.xlu1 %2303  ;;  %v2437_v62 = vsel %vm2409_vm13, %v2436_v2, %v2432_v32 }
 0x238   : > { %v2301_v23 = vpop.xlane.xlu0 %2300  ;;  %v2450_v6 = vrot.slane %v2304_v33, %v3753_v38  ;;  %v2551_v60 = vsel %vm2550_vm0, %v2437_v62, %v2549_v50  ;;  %v2588_v33 = vadd.f32 %v2586_v4, %v3337_v22 }
 0x239   : > { %v2445_v43 = vrot.slane %v2301_v23, %v3749_v16 }
 0x23a   : > { %3120 = vrcp.f32 %v2588_v33 }
 0x23b   : > { %v2310_v24 = vpop.xlane.xlu1 %2309  ;;  %v2446_v1 = vsel %vm2409_vm13, %v2445_v43, %v2441_v58 }
 0x23c   : > { %v2307_v25 = vpop.xlane.xlu0 %2306  ;;  %v2459_v13 = vrot.slane %v2310_v24, %v3753_v38  ;;  %v2553_v63 = vsel %vm2552_vm3, %v2446_v1, %v2551_v60 }
 0x23d   : > { %v2454_v48 = vrot.slane %v2307_v25, %v3749_v16 }
 0x23f   : > { %v2316_v26 = vpop.xlane.xlu1 %2315  ;;  %v2455_v49 = vsel %vm2409_vm13, %v2454_v48, %v2450_v6 }
 0x240   : > { %v2313_v35 = vpop.xlane.xlu0 %2312  ;;  %v2468_v31 = vrot.slane %v2316_v26, %v3753_v38  ;;  %v2555_v15 = vsel %vm2554_vm6, %v2455_v49, %v2553_v63 }
 0x241   : > { %v2463_v59 = vrot.slane %v2313_v35, %v3749_v16 }
 0x243   : > { %v3746_v29 = vpop.xlane.xlu1 %2321  ;;  %v2464_v12 = vsel %vm2409_vm13, %v2463_v59, %v2459_v13 }
 0x244   : > { %v2319_v20 = vpop.xlane.xlu0 %2318  ;;  %v2557_v17 = vsel %vm2556_vm7, %v2464_v12, %v2555_v15  ;;  %v2477_v46 = vrot.slane %v3746_v29, %v3753_v38 }
 0x245   : > { %v2472_v0 = vrot.slane %v2319_v20, %v3749_v16 }
 0x247   : > { %v3757_v37 = vpop.xlane.xlu1 %2327  ;;  %v2473_v41 = vsel %vm2409_vm13, %v2472_v0, %v2468_v31  ;;  %v3121_v61 = vpop.eup %3120 }
 0x248   : > { %v3760_v39 = vpop.xlane.xlu0 %2324  ;;  %v2559_v18 = vsel %vm2558_vm10, %v2473_v41, %v2557_v17  ;;  %v2486_v35 = vrot.slane %v3757_v37, %v3753_v38 }
 0x249   : > { %v3804_v23 = vsel %vm443_vm12, %v2559_v18, 0.0  ;;  %v2481_v22 = vrot.slane %v3760_v39, %v3749_v16  ;;  %vm3188_vm12 = vmmov 1  }
 0x24a   : > { %v2590_v25 = vmul.f32 %v3119_v8, %v3804_v23  ;;  %v2571_v10 = vmul.f32 1.05, %v3804_v23 }
 0x24b   : > { %v2334_v52 = vpop.xlane.xlu1 %2333  ;;  %v2482_v3 = vsel %vm2409_vm13, %v2481_v22, %v2477_v46 }
 0x24c   : > { %v2331_v53 = vpop.xlane.xlu0 %2330  ;;  %3122 = vlog2.f32 %v2590_v25  ;;  %v2495_v42 = vrot.slane %v2334_v52, %v3753_v38 }
 0x24d   : > { %v2490_v34 = vrot.slane %v2331_v53, %v3749_v16 }
 0x24f   : > { %v2340_v56 = vpop.xlane.xlu1 %2339  ;;  %v2491_v21 = vsel %vm2409_vm13, %v2490_v34, %v2486_v35 }
 0x250   : > { %v2337_v40 = vpop.xlane.xlu0 %2336  ;;  %v2504_v37 = vrot.slane %v2340_v56, %v3753_v38  ;;  %v2560_v55 = vsel %vm2546_vm14, %v2491_v21, %v2482_v3  ;;  %vm444_vm14 = vmand %vm440_vm9, %vm442_vm11 }
 0x251   : > { %v2499_v30 = vrot.slane %v2337_v40, %v3749_v16 }
 0x253   : > { %v2346_v7 = vpop.xlane.xlu1 %2345  ;;  %v2500_v39 = vsel %vm2409_vm13, %v2499_v30, %v2495_v42 }
 0x254   : > { %v2343_v19 = vpop.xlane.xlu0 %2342  ;;  %v2513_v44 = vrot.slane %v2346_v7, %v3753_v38  ;;  %v2561_v51 = vsel %vm2548_vm15, %v2500_v39, %v2560_v55  ;;  %vm2573_vm15 = vcmp.lt.f32.partialorder %v3345_v27, %v2571_v10 }
 0x255   : > { %v2508_v28 = vrot.slane %v2343_v19, %v3749_v16 }
 0x257   : > { %v2352_v47 = vpop.xlane.xlu1 %2351  ;;  %v2509_v29 = vsel %vm2409_vm13, %v2508_v28, %v2504_v37 }
 0x258   : > { %v2349_v24 = vpop.xlane.xlu0 %2348  ;;  %v2522_v43 = vrot.slane %v2352_v47, %v3753_v38  ;;  %v2562_v58 = vsel %vm2550_vm0, %v2509_v29, %v2561_v51  ;;  %vm2575_vm0 = vcmp.gt.f32.partialorder %v3345_v27, 0.0 }
 0x259   : > { %v2517_v20 = vrot.slane %v2349_v24, %v3749_v16  ;;  %v3123_v31 = vpop.eup %3122 }
 0x25a   : > { %v2594_v56 = vmul.f32 0.6931472, %v3123_v31 }
 0x25b   : > { %v2358_v9 = vpop.xlane.xlu1 %2357  ;;  %v2518_v32 = vsel %vm2409_vm13, %v2517_v20, %v2513_v44  ;;  %v2635_v20 = vld [vmem:[%s3288_s26] sm:$0xff] }
 0x25c   : > { %v2355_v26 = vpop.xlane.xlu0 %2354  ;;  %v2531_v48 = vrot.slane %v2358_v9, %v3753_v38  ;;  %v2563_v54 = vsel %vm2552_vm3, %v2518_v32, %v2562_v58  ;;  %v2636_v9 = vld [vmem:[%s3288_s26 + $0x8] sm:$0xff] }
 0x25d   : > { %v2526_v11 = vrot.slane %v2355_v26, %v3749_v16 }
 0x25f   : > { %v2364_v52 = vpop.xlane.xlu1 %2363  ;;  %v2527_v57 = vsel %vm2409_vm13, %v2526_v11, %v2522_v43 }
 0x260   : > { %v2361_v2 = vpop.xlane.xlu0 %2360  ;;  %v2540_v62 = vrot.slane %v2364_v52, %v3753_v38  ;;  %v2564_v0 = vsel %vm2554_vm6, %v2527_v57, %v2563_v54  ;;  %v2597_v38 = vand.u32 2147483647, %v2594_v56  ;;  %vm2577_vm6 = vmand %vm2573_vm15, %vm2575_vm0  ;;  %vm3886_vm0 = vcmask 130048  }
 0x261   : > { %v2535_v45 = vrot.slane %v2361_v2, %v3749_v16 }
 0x262   : > { %vm2599_vm3 = vcmp.ne.f32.partialorder %v2597_v38, %v2597_v38 }
 0x263   : > { %v2536_v59 = vsel %vm2409_vm13, %v2535_v45, %v2531_v48  ;;  %vm2601_vm1 = vmxor %vm2599_vm3, %vm3188_vm12 }
 0x264   : > { %v2367_v53 = vpop.xlane.xlu0 %2366  ;;  %v2565_v1 = vsel %vm2556_vm7, %v2536_v59, %v2564_v0  ;;  %vm3887_vm3 = vmmov %vm3886_vm0 }
 0x265   : > { %v2544_v6 = vrot.slane %v2367_v53, %v3749_v16 }
 0x267   : > { %v2545_v13 = vsel %vm2409_vm13, %v2544_v6, %v2540_v62  ;;  %vm2576_vm13 = vcmp.gt.f32.partialorder %v3360_v36, 0.0 }
 0x268   : > { %v2566_v5 = vsel %vm2558_vm10, %v2545_v13, %v2565_v1  ;;  %vm2579_vm10 = vcmp.gt.f32.partialorder %v3804_v23, 0.0 }
 0x269   : > { %v2570_v50 = vsel %vm444_vm14, %v2566_v5, 0.0  ;;  %vm2581_vm2 = vmand %vm2577_vm6, %vm2579_vm10 }
 0x26a   : > { %v2592_v49 = vmul.f32 %v3121_v61, %v2570_v50  ;;  %v2572_v60 = vmul.f32 1.05, %v2570_v50  ;;  %vm2603_vm5 = vmand %vm2581_vm2, %vm2601_vm1  ;;  %vm2580_vm9 = vcmp.gt.f32.partialorder %v2570_v50, 0.0 }
 0x26b   : > { %v2860_v27 = vsel %vm2603_vm5, 1.0, %v3187_v14  ;;  %v2605_v63 = vsel %vm2603_vm5, %v2597_v38, 0.0  ;;  %vm3888_vm6 = vmmov %vm3886_vm0 }
 0x26c   : > { %3124 = vlog2.f32 %v2592_v49  ;;  %vm2574_vm7 = vcmp.lt.f32.partialorder %v3360_v36, %v2572_v60  ;;  %v2623_v15 = vsel %vm3886_vm0, %v2860_v27, 0.0  ;;  %v2607_v17 = vsel %vm3888_vm6, %v2605_v63, 0.0 }
 0x26d   : > { %vm2578_vm4 = vmand %vm2574_vm7, %vm2576_vm13 }
 0x26e   : > { %vm2582_vm11 = vmand %vm2578_vm4, %vm2580_vm9 }
 0x26f   : > { %vm3889_vm7 = vmmov %vm3886_vm0 }
 0x279   : > { %v3125_v16 = vpop.eup %3124 }
 0x27a   : > { %v2596_v12 = vmul.f32 0.6931472, %v3125_v16 }
 0x27c   : > { %v2598_v40 = vand.u32 2147483647, %v2596_v12 }
 0x27e   : > { %vm2600_vm14 = vcmp.ne.f32.partialorder %v2598_v40, %v2598_v40 }
 0x27f   : > { %vm2602_vm8 = vmxor %vm2600_vm14, %vm3188_vm12 }
 0x280   : > { %vm2604_vm15 = vmand %vm2582_vm11, %vm2602_vm8 }
 0x281   : > { %v2861_v36 = vsel %vm2604_vm15, 1.0, %v3187_v14  ;;  %v2606_v41 = vsel %vm2604_vm15, %v2598_v40, 0.0 }
 0x282   : > { %v2624_v4 = vsel %vm3887_vm3, %v2861_v36, 0.0  ;;  %v2608_v7 = vsel %vm3889_vm7, %v2606_v41, 0.0 }
 0x283   : > { %v2625_v18 = vadd.f32 %v2624_v4, %v2623_v15  ;;  %v2609_v19 = vadd.f32 %v2608_v7, %v2607_v17 }
 0x285   : > { %2626 = vadd.xlane.f32.xlu0 %v2625_v18  ;;  %2610 = vadd.xlane.f32.xlu1 %v2609_v19 }
 0x30e   : > { %v2627_v8 = vpop.xlane.xlu0 %2626  ;;  %v2611_v33 = vpop.xlane.xlu1 %2610 }
 0x30f   : > { %v2628_v23 = vrot.slane %v2627_v8, 4  ;;  %v2612_v47 = vrot.slane %v2611_v33, 4 }
 0x311   : > { %v2629_v14 = vadd.f32 %v2628_v23, %v2627_v8  ;;  %v2613_v24 = vadd.f32 %v2612_v47, %v2611_v33 }
 0x313   : > { %v2630_v25 = vrot.slane %v2629_v14, 2  ;;  %v2614_v34 = vrot.slane %v2613_v24, 2 }
 0x315   : > { %v2631_v30 = vadd.f32 %v2630_v25, %v2629_v14  ;;  %v2615_v26 = vadd.f32 %v2614_v34, %v2613_v24 }
 0x317   : > { %v2616_v35 = vrot.slane %v2615_v26, 1  ;;  %v2632_v22 = vrot.slane %v2631_v30, 1 }
 0x319   : > { %v2617_v28 = vadd.f32 %v2616_v35, %v2615_v26  ;;  %v2633_v42 = vadd.f32 %v2632_v22, %v2631_v30 }
 0x31b   : > { %3056 = vpush %v2617_v28 }
 0x31c   : > { %3058 = vpush %v2633_v42 }
 0x34c   : > { %s3057_s10 = spop %3056 }
 0x34d   : > { %v2639_v46 = vstv %s3057_s10  ;;  %s3059_s7 = spop %3058 }
 0x34e   : > { %v2643_v21 = vadd.f32 %v2639_v46, %v2635_v20  ;;  %v2640_v37 = vstv %s3059_s7 }
 0x34f   : > { %v2644_v11 = vadd.f32 %v2640_v37, %v2636_v9 }
 0x350   : > { %2645 = vst [vmem:[%s3288_s26] sm:$0xff] %v2643_v21 }
 0x351   : > { %2646 = vst [vmem:[%s3288_s26 + $0x8] sm:$0xff] %v2644_v11 }
 0x352 PF: > { %s15_s19 = sadd.s32 1, %s3183_s19   ;;  %s3890_s15 = smov %s3175_s17 }
 0x353   : > { %p12_p3 = scmp.ge.s32.totalorder %s15_s19, 6   ;;  %s3891_s16 = smov %s3179_s18 }
 0x354   : > { %s3892_s17 = smov %s3895_s21  ;;  %s3893_s18 = smov %s3899_s22 }
 0x355   :  { %14 = sbr.rel (!%p12_p3) target bundleno = 3 (0x3), region = 81 }
 0x35a   :  { %2668 = vsyncpa [#allocation3], 1 }
 0x35b   :  { %2670 = vsyncpa [#allocation3 + $0x1], 1 }

</bundles_post_ra>
